<compile_context>
chip_gen: v7x
topology: tpu7x:2x2x1
jax: 0.10.0
libtpu: 0.0.40
codegen_flags: <defaults>
</compile_context>

<pallas_src>
import jax
import jax.numpy as jnp
from jax.experimental import pallas as pl
from jax.experimental.pallas import tpu as pltpu


def _round_up(x, m):
    return (x + m - 1) // m * m


# ----------------------------- Pallas kernel --------------------------------
def _make_kernel(nb, hw, chid):
    def kernel(x_ref, wc_ref, wf_ref, bf_ref, out_ref):
        # x_ref : (NB*HW, CK)   bf16 im2col patches (+ ones lane for conv bias)
        # wc_ref: (CK, Chid)    bf16 flattened conv weight (+ bias row)
        # wf_ref: (Chid, KPAD)  bf16 folded (wemb @ whead) / HW
        # bf_ref: (1, KPAD)     f32  folded bias (bemb @ whead + bhead)
        # out_ref: (NB, KPAD)   f32  task logits (lane-dense store)

        # 3x3 "same" conv (bias included via the ones lane) as ONE matmul.
        acc = jnp.dot(x_ref[...], wc_ref[...],
                      preferred_element_type=jnp.float32)       # (NB*HW, Chid)
        acc = jnp.maximum(acc, 0.0)                              # ReLU

        # Global average pooling: sum here, 1/HW pre-folded into wf_ref.
        pooled = jnp.sum(acc.reshape(nb, hw, chid), axis=1)      # (NB, Chid) f32

        # Folded feature-projection + task head in one matmul -> (NB, KPAD)
        logits = jnp.dot(pooled.astype(jnp.bfloat16), wf_ref[...],
                         preferred_element_type=jnp.float32) + bf_ref[...]
        out_ref[...] = logits

    return kernel


# ------------------------------ wrapper --------------------------------------
def continual_model_forward(x_nchw, params, task_key=None, batch_block=32,
                            vmem_limit_bytes=48 * 1024 * 1024):
    """Pallas forward. x_nchw: (N, Cin, H, W) float32.

    batch_block guidance: v5e 32-64, v6e 128+, v7x <=64 (keep N//batch_block
    >= 2 so the 'parallel' axis can shard across both TensorCores).
    """
    if task_key is None:
        # TODO(synk): MultiLinear's task_key=None behaviour is undefined in the
        # snippet; we document + default to the first registered task head.
        task_key = next(iter(params["heads"]))

    wh, bh = params["heads"][task_key]
    wc, bc = params["wconv"], params["bconv"]
    we, be = params["wemb"], params["bemb"]

    N, Cin, H, W = x_nchw.shape
    Chid = wc.shape[3]
    K = wh.shape[1]
    HW = H * W
    CK = 9 * Cin + 1                     # im2col width + 1 ones lane (conv bias)
    KPAD = _round_up(K, 128)             # lane-dense output, shared across heads

    NB = _round_up(min(batch_block, _round_up(N, 8)), 8)
    N_pad = _round_up(N, NB)

    # --- im2col patches (wrapper-side layout plumbing) -----------------------
    # NCHW -> NHWC, zero-pad spatially (padding=1), gather the 9 taps on the
    # channel axis.  Stored UNPADDED (width CK) in bf16: HBM traffic is the
    # actual bytes; lane padding to 128 happens only in VMEM.
    x = jnp.transpose(x_nchw, (0, 2, 3, 1)).astype(jnp.float32)
    xp = jnp.pad(x, ((0, 0), (1, 1), (1, 1), (0, 0)))
    patches = jnp.concatenate(
        [xp[:, kh:kh + H, kw:kw + W, :] for kh in range(3) for kw in range(3)],
        axis=-1)                                        # (N, H, W, 9*Cin)
    patches = patches.reshape(N, HW, 9 * Cin)
    ones = jnp.ones((N, HW, 1), patches.dtype)          # bias lane
    patches = jnp.concatenate([patches, ones], axis=-1)  # (N, HW, CK)
    patches = jnp.pad(patches, ((0, N_pad - N), (0, 0), (0, 0)))
    patches = patches.reshape(N_pad * HW, CK).astype(jnp.bfloat16)

    # --- weight folding (mathematically exact up to the bf16 cast) -----------
    # Conv weight (3,3,Cin,Chid) flattened in the same (kh,kw,cin) order as the
    # patch concatenation, with the conv bias appended as the last row.
    wc_flat = wc.reshape(9 * Cin, Chid).astype(jnp.float32)
    wc_p = jnp.concatenate([wc_flat, bc.reshape(1, Chid).astype(jnp.float32)],
                           axis=0).astype(jnp.bfloat16)          # (CK, Chid)

    # Fold the two chained linears (no nonlinearity between them) and the 1/HW
    # of the mean pool into a single weight; fold both biases into one vector.
    wfold = (we.astype(jnp.float32) @ wh.astype(jnp.float32)) / float(HW)
    wfold_p = jnp.pad(wfold, ((0, 0), (0, KPAD - K))).astype(jnp.bfloat16)
    bfold = be.astype(jnp.float32) @ wh.astype(jnp.float32) + bh.astype(jnp.float32)
    bfold_p = jnp.pad(bfold, ((0, 0), (0, KPAD - K))).astype(jnp.float32)

    grid = (N_pad // NB,)
    kernel = _make_kernel(NB, HW, Chid)
    # Weight/bias blocks are tiny (few KB), so we leave them default-buffered;
    # the patches block dominates VMEM (~256 KB * NB double-buffered).
    out = pl.pallas_call(
        kernel,
        out_shape=jax.ShapeDtypeStruct((N_pad, KPAD), jnp.float32),
        grid=grid,
        in_specs=[
            pl.BlockSpec((NB * HW, CK), lambda n: (n, 0)),
            pl.BlockSpec((CK, Chid), lambda n: (0, 0)),
            pl.BlockSpec((Chid, KPAD), lambda n: (0, 0)),
            pl.BlockSpec((1, KPAD), lambda n: (0, 0)),
        ],
        out_specs=pl.BlockSpec((NB, KPAD), lambda n: (n, 0)),
        compiler_params=pltpu.CompilerParams(
            dimension_semantics=("parallel",),
            vmem_limit_bytes=vmem_limit_bytes),
    )(patches, wc_p, wfold_p, bfold_p)

    return out[:N, :K]   # strip batch / class padding (padded rows are garbage)


# --------------------------- pure-JAX reference -------------------------------
def reference_forward(x_nchw, params, task_key):
    wh, bh = params["heads"][task_key]
    wc, bc = params["wconv"], params["bconv"]
    we, be = params["wemb"], params["bemb"]

    x = jnp.transpose(x_nchw, (0, 2, 3, 1)).astype(jnp.float32)
    N, H, W, Cin = x.shape
    Chid = wc.shape[3]
    xp = jnp.pad(x, ((0, 0), (1, 1), (1, 1), (0, 0)))

    acc = jnp.zeros((N, H, W, Chid), jnp.float32)
    for kh in range(3):
        for kw in range(3):
            patch = xp[:, kh:kh + H, kw:kw + W, :]
            acc = acc + jnp.einsum("nhwc,co->nhwo", patch, wc[kh, kw])
    acc = jnp.maximum(acc + bc[0], 0.0)
    pooled = jnp.mean(acc, axis=(1, 2))                      # (N, Chid)
    feat = pooled @ we + be[0]                               # (N, E)
    return feat @ wh + bh[0]                                 # (N, K)


# --------------------------- param construction -------------------------------
def make_params(key, cin, chid, embedding_dim, task_classes):
    ks = jax.random.split(key, 4 + 2 * len(task_classes))
    params = {
        "wconv": 0.1 * jax.random.normal(ks[0], (3, 3, cin, chid), jnp.float32),
        "bconv": 0.1 * jax.random.normal(ks[1], (1, chid), jnp.float32),
        "wemb":  0.1 * jax.random.normal(ks[2], (chid, embedding_dim), jnp.float32),
        "bemb":  0.1 * jax.random.normal(ks[3], (1, embedding_dim), jnp.float32),
        "heads": {},
    }
    # MultiLinear.extend(task_key, num_classes) analog:
    for i, (task, k_cls) in enumerate(task_classes.items()):
        wh = 0.1 * jax.random.normal(ks[4 + 2 * i], (embedding_dim, k_cls),
                                     jnp.float32)
        bh = 0.1 * jax.random.normal(ks[5 + 2 * i], (1, k_cls), jnp.float32)
        params["heads"][task] = (wh, bh)
    return params


if __name__ == "__main__":
    key = jax.random.PRNGKey(0)
    k_x, k_p = jax.random.split(key)

    # Small shapes consistent with the module's forward.
    N, Cin, H, W = 2, 4, 16, 16
    Chid, embedding_dim = 32, 32
    task_classes = {"task_a": 10, "task_b": 5}

    x = jax.random.normal(k_x, (N, Cin, H, W), jnp.float32)
    params = make_params(k_p, Cin, Chid, embedding_dim, task_classes)

    out = jax.block_until_ready(
        continual_model_forward(x, params, task_key="task_a"))
    assert out.shape == (N, task_classes["task_a"])

    # bf16 MXU inputs (f32 accumulation) -> looser tolerance than pure-f32.
    ref = reference_forward(x, params, "task_a")
    if not jnp.allclose(out, ref, atol=3e-2, rtol=3e-2):
        raise AssertionError("Pallas kernel does not match JAX reference (task_a)")

    # Second task head (classifier.extend path) — same padded K, same kernel.
    out_b = jax.block_until_ready(
        continual_model_forward(x, params, task_key="task_b"))
    assert out_b.shape == (N, task_classes["task_b"])
    ref_b = reference_forward(x, params, "task_b")
    if not jnp.allclose(out_b, ref_b, atol=3e-2, rtol=3e-2):
        raise AssertionError("Pallas kernel does not match JAX reference (task_b)")

    print("KERNEL_OK")
</pallas_src>

<mosaic_0001>
module attributes {stable_mosaic.version = 11 : i64} {
  func.func @kernel(%arg0: i32, %arg1: memref<2048x37xbf16, #tpu.memory_space<vmem>>, %arg2: memref<37x32xbf16, #tpu.memory_space<vmem>>, %arg3: memref<32x128xbf16, #tpu.memory_space<vmem>>, %arg4: memref<1x128xf32, #tpu.memory_space<vmem>>, %arg5: memref<8x128xf32, #tpu.memory_space<vmem>>) attributes {dimension_semantics = [#tpu.dimension_semantics<parallel>], iteration_bounds = array<i64: 1>, scalar_prefetch = 0 : i64, scratch_operands = 0 : i64, tpu.core_type = #tpu.core_type<tc>, window_params = [{transform_indices = @transform_0, window_bounds = array<i64: 2048, 37>}, {pipeline_mode = #tpu.pipeline_mode<synchronous>, transform_indices = @transform_1, window_bounds = array<i64: 37, 32>}, {pipeline_mode = #tpu.pipeline_mode<synchronous>, transform_indices = @transform_2, window_bounds = array<i64: 32, 128>}, {pipeline_mode = #tpu.pipeline_mode<synchronous>, transform_indices = @transform_3, window_bounds = array<i64: 1, 128>}, {transform_indices = @transform_4, window_bounds = array<i64: 8, 128>}]} {
    %c0 = arith.constant 0 : index
    %c0_0 = arith.constant 0 : index
    %0 = vector.load %arg1[%c0, %c0_0] : memref<2048x37xbf16, #tpu.memory_space<vmem>>, vector<2048x37xbf16>
    %c0_1 = arith.constant 0 : index
    %c0_2 = arith.constant 0 : index
    %1 = vector.load %arg2[%c0_1, %c0_2] : memref<37x32xbf16, #tpu.memory_space<vmem>>, vector<37x32xbf16>
    %cst = arith.constant dense<0.000000e+00> : vector<2048x32xf32>
    %2 = tpu.matmul %0, %1, %cst {dimension_numbers = #tpu.dot_dimension_numbers<[1], [0], [0], [1], [0, 0, 1, 1], [], []>} : vector<2048x37xbf16>, vector<37x32xbf16>, vector<2048x32xf32> -> vector<2048x32xf32>
    %cst_3 = arith.constant 0.000000e+00 : f32
    %3 = vector.broadcast %cst_3 : f32 to vector<2048x32xf32>
    %4 = arith.maximumf %2, %3 : vector<2048x32xf32>
    %5 = vector.shape_cast %4 : vector<2048x32xf32> to vector<8x256x32xf32>
    %cst_4 = arith.constant dense<0.000000e+00> : vector<8x32xf32>
    %6 = vector.multi_reduction <add>, %5, %cst_4 [1] : vector<8x256x32xf32> to vector<8x32xf32>
    %7 = arith.truncf %6 : vector<8x32xf32> to vector<8x32xbf16>
    %c0_5 = arith.constant 0 : index
    %c0_6 = arith.constant 0 : index
    %8 = vector.load %arg3[%c0_5, %c0_6] : memref<32x128xbf16, #tpu.memory_space<vmem>>, vector<32x128xbf16>
    %cst_7 = arith.constant dense<0.000000e+00> : vector<8x128xf32>
    %9 = tpu.matmul %7, %8, %cst_7 {dimension_numbers = #tpu.dot_dimension_numbers<[1], [0], [0], [1], [0, 0, 1, 1], [], []>} : vector<8x32xbf16>, vector<32x128xbf16>, vector<8x128xf32> -> vector<8x128xf32>
    %c0_8 = arith.constant 0 : index
    %c0_9 = arith.constant 0 : index
    %10 = vector.load %arg4[%c0_8, %c0_9] : memref<1x128xf32, #tpu.memory_space<vmem>>, vector<1x128xf32>
    %11 = vector.broadcast %10 : vector<1x128xf32> to vector<8x128xf32>
    %12 = arith.addf %9, %11 : vector<8x128xf32>
    %c0_10 = arith.constant 0 : index
    %c0_11 = arith.constant 0 : index
    %13 = vector.load %arg5[%c0_10, %c0_11] : memref<8x128xf32, #tpu.memory_space<vmem>>, vector<8x128xf32>
    tpu.vector_store %arg5[%c0_10, %c0_11], %12 {strides = array<i32>} : memref<8x128xf32, #tpu.memory_space<vmem>>, vector<8x128xf32>,
    return
  }
  func.func @transform_0(%arg0: i32) -> (i32, i32) {
    %c0_i32 = arith.constant 0 : i32
    %c0_i32_0 = arith.constant 0 : i32
    return %arg0, %c0_i32 : i32, i32
  }
  func.func @transform_1(%arg0: i32) -> (i32, i32) {
    %c0_i32 = arith.constant 0 : i32
    %c0_i32_0 = arith.constant 0 : i32
    %c0_i32_1 = arith.constant 0 : i32
    return %c0_i32, %c0_i32_0 : i32, i32
  }
  func.func @transform_2(%arg0: i32) -> (i32, i32) {
    %c0_i32 = arith.constant 0 : i32
    %c0_i32_0 = arith.constant 0 : i32
    %c0_i32_1 = arith.constant 0 : i32
    return %c0_i32, %c0_i32_0 : i32, i32
  }
  func.func @transform_3(%arg0: i32) -> (i32, i32) {
    %c0_i32 = arith.constant 0 : i32
    %c0_i32_0 = arith.constant 0 : i32
    %c0_i32_1 = arith.constant 0 : i32
    return %c0_i32, %c0_i32_0 : i32, i32
  }
  func.func @transform_4(%arg0: i32) -> (i32, i32) {
    %c0_i32 = arith.constant 0 : i32
    %c0_i32_0 = arith.constant 0 : i32
    return %arg0, %c0_i32 : i32, i32
  }
}

</mosaic_0001>

<bundles_post_ra>
// kernel: tpu_custom_call.1
= control target key start
LH: loop header
LB: loop body
LE: loop exit
PB: predicated region body
PF: predicated region fallthrough
CT: control target
= control target key end

     0   :  { %vm1320_vm0 = vcmask 1041408   ;;  %vm1321_vm1 = vcmask 1042432   ;;  %v4147_v3 = vmov 65535   ;;  %vm935_vm2 = vcmask 302080   ;;  %s5089_s0 = inlined_call_operand.vmem [shape: bf16[2048,37], index: 0, kind: input, shape index: {}]   ;;  %s5090_s1 = inlined_call_operand.vmem [shape: bf16[37,32], index: 1, kind: input, shape index: {}]   ;;  %s5091_s2 = inlined_call_operand.vmem [shape: bf16[32,128], index: 2, kind: input, shape index: {}]   ;;  %s5092_s3 = inlined_call_operand.vmem [shape: f32[1,128], index: 3, kind: input, shape index: {}]   ;;  %s5093_s4 = inlined_call_operand.hbm [shape: f32[8,128], index: 4, kind: output, shape index: {}]  }
   0x1   :  { %v3990_v0 = vld [vmem:[%s5090_s1] sm:$0xff]   ;;  %v3991_v1 = vld [vmem:[%s5090_s1 + $0x8] sm:$0xff]   ;;  %v3992_v2 = vld [vmem:[%s5090_s1 + $0x10] ss:$0 sps:$4 sm:$0x77]   ;;  %v1322_v4 = vsel %vm1320_vm0, 4294967295, %v4147_v3 }
   0x2   :  { %3710 = vmatprep.subr.bf16.mxu0 %v3990_v0  ;;  %3980 = vmatprep.subr.bf16.mxu1 %v3990_v0  ;;  %v3993_v5 = vld [vmem:[%s5089_s0] sm:$0xff]   ;;  %v1323_v6 = vsel %vm1321_vm1, %v1322_v4, 0  ;;  %v3994_v8 = vld [vmem:[%s5089_s0 + $0x8] sm:$0xff]   ;;  %v3995_v9 = vld [vmem:[%s5089_s0 + $0x10] sm:$0xff]  }
   0x3   :  { %3711 = vmatpush3.bf16.msra.mxu0 %v3990_v0  ;;  %3983 = vmatpush3.bf16.msra.mxu1 %v3990_v0  ;;  %v1325_v7 = vand.u32 %v3992_v2, %v1323_v6  ;;  %v3996_v10 = vld [vmem:[%s5089_s0 + $0x18] sm:$0xff]   ;;  %v3997_v11 = vld [vmem:[%s5089_s0 + $0x20] sm:$0xff]   ;;  %v4009_v12 = vld [vmem:[%s5089_s0 + $0x210] sm:$0xff]  }
   0x4   :  { %3712 = vmatprep.subr.bf16.mxu0 %v3991_v1  ;;  %3981 = vmatprep.subr.bf16.mxu1 %v3991_v1  ;;  %v4010_v13 = vld [vmem:[%s5089_s0 + $0x218] sm:$0xff]   ;;  %v4013_v14 = vld [vmem:[%s5089_s0 + $0x220] sm:$0xff]   ;;  %v3998_v15 = vld [vmem:[%s5089_s0 + $0x28] sm:$0xff]  }
   0x5   :  { %3716 = vmatprep.mubr.msk.bf16.mxu0 %vm935_vm2, %v3993_v5  ;;  %3848 = vmatprep.mubr.msk.bf16.mxu1 %vm935_vm2, %v4009_v12  ;;  %v3999_v16 = vld [vmem:[%s5089_s0 + $0x30] sm:$0xff]   ;;  %v4014_v17 = vld [vmem:[%s5089_s0 + $0x228] sm:$0xff]   ;;  %v4000_v19 = vld [vmem:[%s5089_s0 + $0x38] sm:$0xff]  }
   0x6   :  { %v4017_v18 = vld [vmem:[%s5089_s0 + $0x230] sm:$0xff]   ;;  %v4001_v20 = vld [vmem:[%s5089_s0 + $0x40] sm:$0xff]   ;;  %v4018_v21 = vld [vmem:[%s5089_s0 + $0x238] sm:$0xff]  }
   0x7   :  { %3713 = vmatpush3.bf16.msra.mxu0 %v3991_v1  ;;  %3984 = vmatpush3.bf16.msra.mxu1 %v3991_v1  ;;  %v4021_v22 = vld [vmem:[%s5089_s0 + $0x240] sm:$0xff]   ;;  %v4002_v23 = vld [vmem:[%s5089_s0 + $0x48] sm:$0xff]   ;;  %v4003_v24 = vld [vmem:[%s5089_s0 + $0x50] sm:$0xff]  }
   0x8   :  { %3714 = vmatprep.subr.bf16.mxu0 %v1325_v7  ;;  %3982 = vmatprep.subr.bf16.mxu1 %v1325_v7  ;;  %v4022_v25 = vld [vmem:[%s5089_s0 + $0x248] sm:$0xff]   ;;  %v4025_v26 = vld [vmem:[%s5089_s0 + $0x250] sm:$0xff]   ;;  %v4004_v27 = vld [vmem:[%s5089_s0 + $0x58] sm:$0xff]  }
   0x9   :  { %v4005_v28 = vld [vmem:[%s5089_s0 + $0x60] sm:$0xff]   ;;  %v4026_v29 = vld [vmem:[%s5089_s0 + $0x258] sm:$0xff]   ;;  %v4006_v31 = vld [vmem:[%s5089_s0 + $0x68] sm:$0xff]  }
   0xa   :  { %v4029_v30 = vld [vmem:[%s5089_s0 + $0x260] sm:$0xff]   ;;  %v4007_v32 = vld [vmem:[%s5089_s0 + $0x70] sm:$0xff]   ;;  %v4030_v33 = vld [vmem:[%s5089_s0 + $0x268] sm:$0xff]  }
   0xb   :  { %3715 = vmatpush3.bf16.msra.mxu0 %v1325_v7  ;;  %3985 = vmatpush3.bf16.msra.mxu1 %v1325_v7  ;;  %v4033_v34 = vld [vmem:[%s5089_s0 + $0x270] sm:$0xff]   ;;  %v4008_v35 = vld [vmem:[%s5089_s0 + $0x78] sm:$0xff]   ;;  %v4011_v36 = vld [vmem:[%s5089_s0 + $0x80] sm:$0xff]  }
   0xc   :  { %v4034_v37 = vld [vmem:[%s5089_s0 + $0x278] sm:$0xff]   ;;  %v4037_v38 = vld [vmem:[%s5089_s0 + $0x280] sm:$0xff]   ;;  %v4012_v39 = vld [vmem:[%s5089_s0 + $0x88] sm:$0xff]  }
   0xd   :  { %v4015_v40 = vld [vmem:[%s5089_s0 + $0x90] sm:$0xff]   ;;  %v4038_v41 = vld [vmem:[%s5089_s0 + $0x288] sm:$0xff]   ;;  %v4016_v43 = vld [vmem:[%s5089_s0 + $0x98] sm:$0xff]  }
   0xe   :  { %3717 = vmatmul.mubr.msk.bf16.vlgmr.msra.gmra.mrb[0].mxu0 %vm935_vm2, %v3994_v8  ;;  %3849 = vmatmul.mubr.msk.bf16.vlgmr.msra.gmra.mrb[0].mxu1 %vm935_vm2, %v4010_v13  ;;  %v4041_v42 = vld [vmem:[%s5089_s0 + $0x290] sm:$0xff]   ;;  %v4019_v44 = vld [vmem:[%s5089_s0 + $0xa0] sm:$0xff]   ;;  %v4042_v45 = vld [vmem:[%s5089_s0 + $0x298] sm:$0xff]  }
   0xf   :  { %3720 = vmatprep.mubr.msk.bf16.mxu0 %vm935_vm2, %v3995_v9  ;;  %3852 = vmatprep.mubr.msk.bf16.mxu1 %vm935_vm2, %v4013_v14  ;;  %v4045_v46 = vld [vmem:[%s5089_s0 + $0x2a0] sm:$0xff]   ;;  %v4020_v47 = vld [vmem:[%s5089_s0 + $0xa8] sm:$0xff]   ;;  %v4023_v48 = vld [vmem:[%s5089_s0 + $0xb0] sm:$0xff]  }
  0x10   :  { %v4046_v49 = vld [vmem:[%s5089_s0 + $0x2a8] sm:$0xff]   ;;  %v4049_v50 = vld [vmem:[%s5089_s0 + $0x2b0] sm:$0xff]   ;;  %v4024_v51 = vld [vmem:[%s5089_s0 + $0xb8] sm:$0xff]  }
  0x11   :  { %v4027_v52 = vld [vmem:[%s5089_s0 + $0xc0] sm:$0xff]   ;;  %v4050_v53 = vld [vmem:[%s5089_s0 + $0x2b8] sm:$0xff]   ;;  %v4028_v55 = vld [vmem:[%s5089_s0 + $0xc8] sm:$0xff]  }
  0x12   :  { %v4053_v54 = vld [vmem:[%s5089_s0 + $0x2c0] sm:$0xff]   ;;  %v4031_v56 = vld [vmem:[%s5089_s0 + $0xd0] sm:$0xff]   ;;  %v4054_v57 = vld [vmem:[%s5089_s0 + $0x2c8] sm:$0xff]  }
  0x13   :  { %v4057_v58 = vld [vmem:[%s5089_s0 + $0x2d0] sm:$0xff]   ;;  %v4032_v59 = vld [vmem:[%s5089_s0 + $0xd8] sm:$0xff]   ;;  %v4035_v60 = vld [vmem:[%s5089_s0 + $0xe0] sm:$0xff]  }
  0x14   :  { %v4058_v61 = vld [vmem:[%s5089_s0 + $0x2d8] sm:$0xff]   ;;  %v4061_v62 = vld [vmem:[%s5089_s0 + $0x2e0] sm:$0xff]   ;;  %v4036_v63 = vld [vmem:[%s5089_s0 + $0xe8] sm:$0xff]  }
  0x15   :  { %v4039_v0 = vld [vmem:[%s5089_s0 + $0xf0] sm:$0xff]   ;;  %v4062_v1 = vld [vmem:[%s5089_s0 + $0x2e8] sm:$0xff]  }
  0x16   :  { %3721 = vmatmul.mubr.msk.bf16.gmra.mrb[4].mxu0 %vm935_vm2, %v3996_v10  ;;  %3853 = vmatmul.mubr.msk.bf16.gmra.mrb[4].mxu1 %vm935_vm2, %v4014_v17  ;;  %v4065_v2 = vld [vmem:[%s5089_s0 + $0x2f0] sm:$0xff]  }
  0x17   :  { %3724 = vmatprep.mubr.msk.bf16.mxu0 %vm935_vm2, %v3997_v11  ;;  %3856 = vmatprep.mubr.msk.bf16.mxu1 %vm935_vm2, %v4017_v18 }
  0x1e   :  { %3725 = vmatmul.mubr.msk.bf16.gmra.mrb[8].mxu0 %vm935_vm2, %v3998_v15  ;;  %3857 = vmatmul.mubr.msk.bf16.gmra.mrb[8].mxu1 %vm935_vm2, %v4018_v21 }
  0x1f   :  { %3728 = vmatprep.mubr.msk.bf16.mxu0 %vm935_vm2, %v3999_v16  ;;  %3860 = vmatprep.mubr.msk.bf16.mxu1 %vm935_vm2, %v4021_v22 }
  0x26   :  { %3729 = vmatmul.mubr.msk.bf16.gmra.mrb[12].mxu0 %vm935_vm2, %v4000_v19  ;;  %3861 = vmatmul.mubr.msk.bf16.gmra.mrb[12].mxu1 %vm935_vm2, %v4022_v25 }
  0x27   :  { %3732 = vmatprep.mubr.msk.bf16.mxu0 %vm935_vm2, %v4001_v20  ;;  %3864 = vmatprep.mubr.msk.bf16.mxu1 %vm935_vm2, %v4025_v26 }
  0x2e   :  { %3733 = vmatmul.mubr.msk.bf16.gmra.mrb[16].mxu0 %vm935_vm2, %v4002_v23  ;;  %3865 = vmatmul.mubr.msk.bf16.gmra.mrb[16].mxu1 %vm935_vm2, %v4026_v29 }
  0x2f   :  { %3736 = vmatprep.mubr.msk.bf16.mxu0 %vm935_vm2, %v4003_v24  ;;  %3868 = vmatprep.mubr.msk.bf16.mxu1 %vm935_vm2, %v4029_v30 }
  0x36   :  { %3737 = vmatmul.mubr.msk.bf16.gmra.mrb[20].mxu0 %vm935_vm2, %v4004_v27  ;;  %3869 = vmatmul.mubr.msk.bf16.gmra.mrb[20].mxu1 %vm935_vm2, %v4030_v33 }
  0x37   :  { %3740 = vmatprep.mubr.msk.bf16.mxu0 %vm935_vm2, %v4005_v28  ;;  %3872 = vmatprep.mubr.msk.bf16.mxu1 %vm935_vm2, %v4033_v34 }
  0x3e   :  { %3741 = vmatmul.mubr.msk.bf16.gmra.mrb[24].mxu0 %vm935_vm2, %v4006_v31  ;;  %3873 = vmatmul.mubr.msk.bf16.gmra.mrb[24].mxu1 %vm935_vm2, %v4034_v37 }
  0x3f   :  { %3744 = vmatprep.mubr.msk.bf16.mxu0 %vm935_vm2, %v4007_v32  ;;  %3876 = vmatprep.mubr.msk.bf16.mxu1 %vm935_vm2, %v4037_v38 }
  0x46   :  { %3745 = vmatmul.mubr.msk.bf16.gmra.mrb[28].mxu0 %vm935_vm2, %v4008_v35  ;;  %3877 = vmatmul.mubr.msk.bf16.gmra.mrb[28].mxu1 %vm935_vm2, %v4038_v41 }
  0x47   :  { %3748 = vmatprep.mubr.msk.bf16.mxu0 %vm935_vm2, %v4011_v36  ;;  %3880 = vmatprep.mubr.msk.bf16.mxu1 %vm935_vm2, %v4041_v42 }
  0x4e   :  { %3749 = vmatmul.mubr.msk.bf16.gmra.mrb[32].mxu0 %vm935_vm2, %v4012_v39  ;;  %3881 = vmatmul.mubr.msk.bf16.gmra.mrb[32].mxu1 %vm935_vm2, %v4042_v45 }
  0x4f   :  { %3752 = vmatprep.mubr.msk.bf16.mxu0 %vm935_vm2, %v4015_v40  ;;  %3884 = vmatprep.mubr.msk.bf16.mxu1 %vm935_vm2, %v4045_v46 }
  0x56   :  { %3753 = vmatmul.mubr.msk.bf16.gmra.mrb[36].mxu0 %vm935_vm2, %v4016_v43  ;;  %3885 = vmatmul.mubr.msk.bf16.gmra.mrb[36].mxu1 %vm935_vm2, %v4046_v49 }
  0x57   :  { %3756 = vmatprep.mubr.msk.bf16.mxu0 %vm935_vm2, %v4019_v44  ;;  %3888 = vmatprep.mubr.msk.bf16.mxu1 %vm935_vm2, %v4049_v50 }
  0x5e   :  { %3757 = vmatmul.mubr.msk.bf16.gmra.mrb[40].mxu0 %vm935_vm2, %v4020_v47  ;;  %3889 = vmatmul.mubr.msk.bf16.gmra.mrb[40].mxu1 %vm935_vm2, %v4050_v53 }
  0x5f   :  { %3760 = vmatprep.mubr.msk.bf16.mxu0 %vm935_vm2, %v4023_v48  ;;  %3892 = vmatprep.mubr.msk.bf16.mxu1 %vm935_vm2, %v4053_v54 }
  0x66   :  { %3761 = vmatmul.mubr.msk.bf16.gmra.mrb[44].mxu0 %vm935_vm2, %v4024_v51  ;;  %3893 = vmatmul.mubr.msk.bf16.gmra.mrb[44].mxu1 %vm935_vm2, %v4054_v57 }
  0x67   :  { %3764 = vmatprep.mubr.msk.bf16.mxu0 %vm935_vm2, %v4027_v52  ;;  %3896 = vmatprep.mubr.msk.bf16.mxu1 %vm935_vm2, %v4057_v58 }
  0x6e   :  { %3765 = vmatmul.mubr.msk.bf16.gmra.mrb[48].mxu0 %vm935_vm2, %v4028_v55  ;;  %3897 = vmatmul.mubr.msk.bf16.gmra.mrb[48].mxu1 %vm935_vm2, %v4058_v61 }
  0x6f   :  { %3768 = vmatprep.mubr.msk.bf16.mxu0 %vm935_vm2, %v4031_v56  ;;  %3900 = vmatprep.mubr.msk.bf16.mxu1 %vm935_vm2, %v4061_v62 }
  0x76   :  { %3769 = vmatmul.mubr.msk.bf16.gmra.mrb[52].mxu0 %vm935_vm2, %v4032_v59 }
  0x77   :  { %3772 = vmatprep.mubr.msk.bf16.mxu0 %vm935_vm2, %v4035_v60 }
  0x7e   :  { %3773 = vmatmul.mubr.msk.bf16.gmra.mrb[56].mxu0 %vm935_vm2, %v4036_v63 }
  0x7f   :  { %9 = vsyncpa [#allocation3], 0  ;;  %3776 = vmatprep.mubr.msk.bf16.mxu0 %vm935_vm2, %v4039_v0  ;;  %3901 = vmatmul.mubr.msk.bf16.gmra.mrb[52].mxu1 %vm935_vm2, %v4062_v1  ;;  %v4040_v3 = vld [vmem:[%s5089_s0 + $0xf8] sm:$0xff]   ;;  %v4043_v4 = vld [vmem:[%s5089_s0 + $0x100] sm:$0xff]   ;;  %v4148_v39 = vmov 0.0   ;;  %vm2640_vm3 = vcmask 261120  }
  0x80   :  { %3904 = vmatprep.mubr.msk.bf16.mxu1 %vm935_vm2, %v4065_v2  ;;  %v4066_v5 = vld [vmem:[%s5089_s0 + $0x2f8] sm:$0xff]   ;;  %v4069_v6 = vld [vmem:[%s5089_s0 + $0x300] sm:$0xff]   ;;  %v4044_v7 = vld [vmem:[%s5089_s0 + $0x108] sm:$0xff]   ;;  %3972 = vmatprep.subr.bf16.mxu1 %v4148_v39  ;;  %vm3228_vm4 = vcmask 1041409   ;;  %vm4149_vm5 = vmmov 0   ;;  %vm3230_vm6 = vcmask 1042434  }
  0x81   :  { %v4047_v8 = vld [vmem:[%s5089_s0 + $0x110] sm:$0xff]   ;;  %v4070_v9 = vld [vmem:[%s5089_s0 + $0x308] sm:$0xff]   ;;  %v4048_v11 = vld [vmem:[%s5089_s0 + $0x118] sm:$0xff]   ;;  %vm3232_vm7 = vcmask 1043459   ;;  %vm3234_vm8 = vcmask 1044484   ;;  %vm3236_vm9 = vcmask 1045509  }
  0x82   :  { %v4073_v10 = vld [vmem:[%s5089_s0 + $0x310] sm:$0xff]   ;;  %v4051_v12 = vld [vmem:[%s5089_s0 + $0x120] sm:$0xff]   ;;  %v4074_v13 = vld [vmem:[%s5089_s0 + $0x318] sm:$0xff]   ;;  %vm3238_vm10 = vcmask 1046534   ;;  %vm3240_vm11 = vcmask 1047559   ;;  %s4150_s11 = smov [#allocation2]  }
  0x83   :  { %v4077_v14 = vld [vmem:[%s5089_s0 + $0x320] sm:$0xff]   ;;  %v4052_v15 = vld [vmem:[%s5089_s0 + $0x128] sm:$0xff]   ;;  %v4055_v16 = vld [vmem:[%s5089_s0 + $0x130] sm:$0xff]   ;;  %s3305_s12 = sshll.u32 %s4150_s11, 4  ;;  %s3306_s12 = int_to_ptr.vmem [resolvable:$true] %s3305_s12 }
  0x84   :  { %v4078_v17 = vld [vmem:[%s5089_s0 + $0x328] sm:$0xff]   ;;  %v4081_v18 = vld [vmem:[%s5089_s0 + $0x330] sm:$0xff]   ;;  %v4056_v19 = vld [vmem:[%s5089_s0 + $0x138] sm:$0xff]   ;;  %s4123_s13 = scalar_lea.vmem %s3306_s12, 128  ;;  %p4128_p1 = scmp.lt.s32.totalorder %s3306_s12, %s3306_s12 }
  0x85   :  { %v4059_v20 = vld [vmem:[%s5089_s0 + $0x140] sm:$0xff]   ;;  %v4082_v21 = vld [vmem:[%s5089_s0 + $0x338] sm:$0xff]   ;;  %v4060_v23 = vld [vmem:[%s5089_s0 + $0x148] sm:$0xff]   ;;  %p4124_p0 = scmp.ne.s32.totalorder %s3306_s12, %s4123_s13  ;;  %p4129_p2 = scmp.lt.s32.totalorder %s4123_s13, %s4123_s13 }
  0x86   :  { %3777 = vmatmul.mubr.msk.bf16.gmra.mrb[60].mxu0 %vm935_vm2, %v4040_v3  ;;  %v4085_v22 = vld [vmem:[%s5089_s0 + $0x340] sm:$0xff]   ;;  %v4063_v24 = vld [vmem:[%s5089_s0 + $0x150] sm:$0xff]   ;;  %v4086_v25 = vld [vmem:[%s5089_s0 + $0x348] sm:$0xff]  }
  0x87   :  { %3780 = vmatprep.mubr.msk.bf16.mxu0 %vm935_vm2, %v4043_v4  ;;  %3905 = vmatmul.mubr.msk.bf16.gmra.mrb[56].mxu1 %vm935_vm2, %v4066_v5  ;;  %v4089_v26 = vld [vmem:[%s5089_s0 + $0x350] sm:$0xff]   ;;  %v4064_v27 = vld [vmem:[%s5089_s0 + $0x158] sm:$0xff]   ;;  %v4067_v28 = vld [vmem:[%s5089_s0 + $0x160] sm:$0xff]   ;;  %p4130_p3 = por %p4129_p2, %p4128_p1 }
  0x88   :  { %3908 = vmatprep.mubr.msk.bf16.mxu1 %vm935_vm2, %v4069_v6  ;;  %v4090_v29 = vld [vmem:[%s5089_s0 + $0x358] sm:$0xff]   ;;  %v4093_v30 = vld [vmem:[%s5089_s0 + $0x360] sm:$0xff]   ;;  %v4068_v31 = vld [vmem:[%s5089_s0 + $0x168] sm:$0xff]  }
  0x89   :  { %v4071_v32 = vld [vmem:[%s5089_s0 + $0x170] sm:$0xff]   ;;  %v4094_v33 = vld [vmem:[%s5089_s0 + $0x368] sm:$0xff]   ;;  %v4072_v35 = vld [vmem:[%s5089_s0 + $0x178] sm:$0xff]   ;;  %p4131_p4 = pnand %p4130_p3, %p4124_p0 }
  0x8a   :  { %v4097_v34 = vld [vmem:[%s5089_s0 + $0x370] sm:$0xff]   ;;  %v4075_v36 = vld [vmem:[%s5089_s0 + $0x180] sm:$0xff]   ;;  %v4098_v37 = vld [vmem:[%s5089_s0 + $0x378] sm:$0xff]  }
  0x8b   :  { %v4101_v38 = vld [vmem:[%s5089_s0 + $0x380] sm:$0xff]   ;;  %v4076_v40 = vld [vmem:[%s5089_s0 + $0x188] sm:$0xff]   ;;  %v4079_v42 = vld [vmem:[%s5089_s0 + $0x190] sm:$0xff]  }
  0x8c   :  { %v4121_v41 = vld [vmem:[%s5091_s2] sm:$0xff]   ;;  %v4102_v43 = vld [vmem:[%s5089_s0 + $0x388] sm:$0xff]   ;;  %v4105_v44 = vld [vmem:[%s5089_s0 + $0x390] sm:$0xff]  }
  0x8d   :  { %3973 = vmatpush3.bf16.msra.mxu1 %v4121_v41  ;;  %v4080_v45 = vld [vmem:[%s5089_s0 + $0x198] sm:$0xff]   ;;  %v4083_v46 = vld [vmem:[%s5089_s0 + $0x1a0] sm:$0xff]   ;;  %v4084_v49 = vld [vmem:[%s5089_s0 + $0x1a8] sm:$0xff]  }
  0x8e   :  { %3781 = vmatmul.mubr.msk.bf16.gmra.mrb[64].mxu0 %vm935_vm2, %v4044_v7  ;;  %3974 = vmatprep.subr.bf16.mxu1 %v4148_v39  ;;  %v4106_v47 = vld [vmem:[%s5089_s0 + $0x398] sm:$0xff]   ;;  %v4109_v48 = vld [vmem:[%s5089_s0 + $0x3a0] sm:$0xff]   ;;  %v4087_v50 = vld [vmem:[%s5089_s0 + $0x1b0] sm:$0xff]  }
  0x8f   :  { %3784 = vmatprep.mubr.msk.bf16.mxu0 %vm935_vm2, %v4047_v8  ;;  %3909 = vmatmul.mubr.msk.bf16.gmra.mrb[60].mxu1 %vm935_vm2, %v4070_v9  ;;  %v4110_v51 = vld [vmem:[%s5089_s0 + $0x3a8] sm:$0xff]   ;;  %v4111_v52 = vld [vmem:[%s5089_s0 + $0x3b0] sm:$0xff]   ;;  %v4088_v55 = vld [vmem:[%s5089_s0 + $0x1b8] sm:$0xff]  }
  0x90   :  { %3912 = vmatprep.mubr.msk.bf16.mxu1 %vm935_vm2, %v4073_v10  ;;  %v4091_v58 = vld [vmem:[%s5089_s0 + $0x1c0] sm:$0xff]   ;;  %v4112_v59 = vld [vmem:[%s5089_s0 + $0x3b8] sm:$0xff]   ;;  %v4092_v8 = vld [vmem:[%s5089_s0 + $0x1c8] sm:$0xff]  }
  0x91   :  { %v4113_v61 = vld [vmem:[%s5089_s0 + $0x3c0] sm:$0xff]  }
  0x96   :  { %3785 = vmatmul.mubr.msk.bf16.gmra.mrb[68].mxu0 %vm935_vm2, %v4048_v11 }
  0x97   :  { %3788 = vmatprep.mubr.msk.bf16.mxu0 %vm935_vm2, %v4051_v12  ;;  %3913 = vmatmul.mubr.msk.bf16.gmra.mrb[64].mxu1 %vm935_vm2, %v4074_v13  ;;  %v4095_v13 = vld [vmem:[%s5089_s0 + $0x1d0] sm:$0xff]  }
  0x98   :  { %3916 = vmatprep.mubr.msk.bf16.mxu1 %vm935_vm2, %v4077_v14  ;;  %v4114_v14 = vld [vmem:[%s5089_s0 + $0x3c8] sm:$0xff]  }
  0x9e   :  { %3789 = vmatmul.mubr.msk.bf16.gmra.mrb[72].mxu0 %vm935_vm2, %v4052_v15 }
  0x9f   :  { %3792 = vmatprep.mubr.msk.bf16.mxu0 %vm935_vm2, %v4055_v16  ;;  %3917 = vmatmul.mubr.msk.bf16.gmra.mrb[68].mxu1 %vm935_vm2, %v4078_v17 }
  0xa0   :  { %3920 = vmatprep.mubr.msk.bf16.mxu1 %vm935_vm2, %v4081_v18 }
  0xa6   :  { %3793 = vmatmul.mubr.msk.bf16.gmra.mrb[76].mxu0 %vm935_vm2, %v4056_v19  ;;  %v4115_v19 = vld [vmem:[%s5089_s0 + $0x3d0] sm:$0xff]  }
  0xa7   :  { %3796 = vmatprep.mubr.msk.bf16.mxu0 %vm935_vm2, %v4059_v20  ;;  %3921 = vmatmul.mubr.msk.bf16.gmra.mrb[72].mxu1 %vm935_vm2, %v4082_v21 }
  0xa8   :  { %3924 = vmatprep.mubr.msk.bf16.mxu1 %vm935_vm2, %v4085_v22 }
  0xae   :  { %3797 = vmatmul.mubr.msk.bf16.gmra.mrb[80].mxu0 %vm935_vm2, %v4060_v23 }
  0xaf   :  { %3800 = vmatprep.mubr.msk.bf16.mxu0 %vm935_vm2, %v4063_v24  ;;  %3925 = vmatmul.mubr.msk.bf16.gmra.mrb[76].mxu1 %vm935_vm2, %v4086_v25 }
  0xb0   :  { %3928 = vmatprep.mubr.msk.bf16.mxu1 %vm935_vm2, %v4089_v26 }
  0xb6   :  { %3801 = vmatmul.mubr.msk.bf16.gmra.mrb[84].mxu0 %vm935_vm2, %v4064_v27 }
  0xb7   :  { %3804 = vmatprep.mubr.msk.bf16.mxu0 %vm935_vm2, %v4067_v28  ;;  %3929 = vmatmul.mubr.msk.bf16.gmra.mrb[80].mxu1 %vm935_vm2, %v4090_v29 }
  0xb8   :  { %3932 = vmatprep.mubr.msk.bf16.mxu1 %vm935_vm2, %v4093_v30 }
  0xbe   :  { %3805 = vmatmul.mubr.msk.bf16.gmra.mrb[88].mxu0 %vm935_vm2, %v4068_v31 }
  0xbf   :  { %3808 = vmatprep.mubr.msk.bf16.mxu0 %vm935_vm2, %v4071_v32  ;;  %3933 = vmatmul.mubr.msk.bf16.gmra.mrb[84].mxu1 %vm935_vm2, %v4094_v33  ;;  %v4096_v32 = vld [vmem:[%s5089_s0 + $0x1d8] sm:$0xff]  }
  0xc0   :  { %3936 = vmatprep.mubr.msk.bf16.mxu1 %vm935_vm2, %v4097_v34 }
  0xc6   :  { %3809 = vmatmul.mubr.msk.bf16.gmra.mrb[92].mxu0 %vm935_vm2, %v4072_v35 }
  0xc7   :  { %3812 = vmatprep.mubr.msk.bf16.mxu0 %vm935_vm2, %v4075_v36  ;;  %3937 = vmatmul.mubr.msk.bf16.gmra.mrb[88].mxu1 %vm935_vm2, %v4098_v37  ;;  %v4099_v37 = vld [vmem:[%s5089_s0 + $0x1e0] sm:$0xff]  }
  0xc8   :  { %3940 = vmatprep.mubr.msk.bf16.mxu1 %vm935_vm2, %v4101_v38  ;;  %v4116_v38 = vld [vmem:[%s5089_s0 + $0x3d8] sm:$0xff]  }
  0xce   :  { %3813 = vmatmul.mubr.msk.bf16.gmra.mrb[96].mxu0 %vm935_vm2, %v4076_v40 }
  0xcf   :  { %3816 = vmatprep.mubr.msk.bf16.mxu0 %vm935_vm2, %v4079_v42  ;;  %3941 = vmatmul.mubr.msk.bf16.gmra.mrb[92].mxu1 %vm935_vm2, %v4102_v43 }
  0xd0   :  { %3944 = vmatprep.mubr.msk.bf16.mxu1 %vm935_vm2, %v4105_v44  ;;  %v4117_v44 = vld [vmem:[%s5089_s0 + $0x3e0] sm:$0xff]  }
  0xd6   :  { %3817 = vmatmul.mubr.msk.bf16.gmra.mrb[100].mxu0 %vm935_vm2, %v4080_v45 }
  0xd7   :  { %3820 = vmatprep.mubr.msk.bf16.mxu0 %vm935_vm2, %v4083_v46  ;;  %3945 = vmatmul.mubr.msk.bf16.gmra.mrb[96].mxu1 %vm935_vm2, %v4106_v47 }
  0xd8   :  { %3948 = vmatprep.mubr.msk.bf16.mxu1 %vm935_vm2, %v4109_v48 }
  0xde   :  { %3821 = vmatmul.mubr.msk.bf16.gmra.mrb[104].mxu0 %vm935_vm2, %v4084_v49 }
  0xdf   :  { %3824 = vmatprep.mubr.msk.bf16.mxu0 %vm935_vm2, %v4087_v50  ;;  %3949 = vmatmul.mubr.msk.bf16.gmra.mrb[100].mxu1 %vm935_vm2, %v4110_v51 }
  0xe0   :  { %3952 = vmatprep.mubr.msk.bf16.mxu1 %vm935_vm2, %v4111_v52 }
  0xe1   :  { %v3718_v53 = vpop.f32.mrb[0].mxu0  ;;  %v4644_v9 = vpop.f32.mrb[0].mxu1 }
  0xe2   :  { %v1361_v54 = vpop.f32.mrb[1].mxu0  ;;  %v2386_v62 = vmax.f32 %v3718_v53, 0.0  ;;  %v4653_v15 = vpop.f32.mrb[1].mxu1 }
  0xe3   :  { %v2384_v56 = vmax.f32 %v1361_v54, 0.0  ;;  %v3719_v57 = vpop.f32.mrb[2].mxu0  ;;  %v4655_v18 = vpop.f32.mrb[2].mxu1 }
  0xe4   :  { %v1364_v60 = vpop.f32.mrb[3].mxu0  ;;  %v2387_v1 = vmax.f32 %v3719_v57, 0.0  ;;  %v2644_v4 = vsel %vm2640_vm3, %v2386_v62, 0.0  ;;  %v4661_v23 = vpop.f32.mrb[3].mxu1  ;;  %v4100_v57 = vld [vmem:[%s5089_s0 + $0x1e8] sm:$0xff]   ;;  %v4103_v62 = vld [vmem:[%s5089_s0 + $0x1f0] sm:$0xff]  }
  0xe5   :  { %v2385_v63 = vmax.f32 %v1364_v60, 0.0  ;;  %v2641_v0 = vsel %vm2640_vm3, %v2384_v56, 0.0 }
  0xe6   :  { %3825 = vmatmul.mubr.msk.bf16.gmra.mrb[108].mxu0 %vm935_vm2, %v4088_v55  ;;  %v2646_v10 = vsel %vm2640_vm3, %v2387_v1, 0.0 }
  0xe7   :  { %v2642_v2 = vsel %vm2640_vm3, %v2385_v63, 0.0  ;;  %3828 = vmatprep.mubr.msk.bf16.mxu0 %vm935_vm2, %v4091_v58  ;;  %3953 = vmatmul.mubr.msk.bf16.gmra.mrb[104].mxu1 %vm935_vm2, %v4112_v59  ;;  %v4118_v63 = vld [vmem:[%s5089_s0 + $0x3e8] sm:$0xff]  }
  0xe8   :  { %v2643_v3 = vadd.f32 %v2642_v2, %v2641_v0  ;;  %3956 = vmatprep.mubr.msk.bf16.mxu1 %vm935_vm2, %v4113_v61 }
  0xe9   :  { %v3722_v5 = vpop.f32.mrb[4].mxu0  ;;  %v4672_v33 = vpop.f32.mrb[4].mxu1 }
  0xea   :  { %v2645_v6 = vadd.f32 %v2644_v4, %v2643_v3  ;;  %v1377_v7 = vpop.f32.mrb[5].mxu0  ;;  %v2390_v20 = vmax.f32 %v3722_v5, 0.0  ;;  %v4681_v40 = vpop.f32.mrb[5].mxu1  ;;  %v4119_v4 = vld [vmem:[%s5089_s0 + $0x3f0] sm:$0xff]  }
  0xeb   :  { %v2388_v11 = vmax.f32 %v1377_v7, 0.0  ;;  %v3723_v12 = vpop.f32.mrb[6].mxu0  ;;  %v4683_v43 = vpop.f32.mrb[6].mxu1 }
  0xec   :  { %v2647_v16 = vadd.f32 %v2646_v10, %v2645_v6  ;;  %v1380_v17 = vpop.f32.mrb[7].mxu0  ;;  %v2391_v25 = vmax.f32 %v3723_v12, 0.0  ;;  %v2652_v28 = vsel %vm2640_vm3, %v2390_v20, 0.0  ;;  %v4689_v48 = vpop.f32.mrb[7].mxu1  ;;  %v4104_v20 = vld [vmem:[%s5089_s0 + $0x1f8] sm:$0xff]  }
  0xed   :  { %v2648_v21 = vsel %vm2640_vm3, %v2388_v11, 0.0  ;;  %v2389_v22 = vmax.f32 %v1380_v17, 0.0 }
  0xee   :  { %v2649_v24 = vadd.f32 %v2648_v21, %v2647_v16  ;;  %3829 = vmatmul.mubr.msk.bf16.gmra.mrb[112].mxu0 %vm935_vm2, %v4092_v8  ;;  %v2654_v34 = vsel %vm2640_vm3, %v2391_v25, 0.0 }
  0xef   :  { %v2650_v26 = vsel %vm2640_vm3, %v2389_v22, 0.0  ;;  %3832 = vmatprep.mubr.msk.bf16.mxu0 %vm935_vm2, %v4095_v13  ;;  %3957 = vmatmul.mubr.msk.bf16.gmra.mrb[108].mxu1 %vm935_vm2, %v4114_v14 }
  0xf0   :  { %v2651_v27 = vadd.f32 %v2650_v26, %v2649_v24  ;;  %3960 = vmatprep.mubr.msk.bf16.mxu1 %vm935_vm2, %v4115_v19  ;;  %v4107_v26 = vld [vmem:[%s5089_s0 + $0x200] sm:$0xff]  }
  0xf1   :  { %v3726_v29 = vpop.f32.mrb[8].mxu0  ;;  %v4700_v58 = vpop.f32.mrb[8].mxu1 }
  0xf2   :  { %v2653_v30 = vadd.f32 %v2652_v28, %v2651_v27  ;;  %v1393_v31 = vpop.f32.mrb[9].mxu0  ;;  %v2394_v45 = vmax.f32 %v3726_v29, 0.0  ;;  %v4709_v0 = vpop.f32.mrb[9].mxu1  ;;  %v4120_v27 = vld [vmem:[%s5089_s0 + $0x3f8] sm:$0xff]  }
  0xf3   :  { %v2392_v35 = vmax.f32 %v1393_v31, 0.0  ;;  %v3727_v36 = vpop.f32.mrb[10].mxu0  ;;  %v4711_v3 = vpop.f32.mrb[10].mxu1 }
  0xf4   :  { %v2655_v41 = vadd.f32 %v2654_v34, %v2653_v30  ;;  %v1396_v42 = vpop.f32.mrb[11].mxu0  ;;  %v2395_v50 = vmax.f32 %v3727_v36, 0.0  ;;  %v2660_v53 = vsel %vm2640_vm3, %v2394_v45, 0.0  ;;  %v4717_v8 = vpop.f32.mrb[11].mxu1 }
  0xf5   :  { %v2656_v46 = vsel %vm2640_vm3, %v2392_v35, 0.0  ;;  %v2393_v47 = vmax.f32 %v1396_v42, 0.0 }
  0xf6   :  { %v2657_v49 = vadd.f32 %v2656_v46, %v2655_v41  ;;  %3833 = vmatmul.mubr.msk.bf16.gmra.mrb[116].mxu0 %vm935_vm2, %v4096_v32  ;;  %v2662_v59 = vsel %vm2640_vm3, %v2395_v50, 0.0 }
  0xf7   :  { %v2658_v51 = vsel %vm2640_vm3, %v2393_v47, 0.0  ;;  %3836 = vmatprep.mubr.msk.bf16.mxu0 %vm935_vm2, %v4099_v37  ;;  %3961 = vmatmul.mubr.msk.bf16.gmra.mrb[112].mxu1 %vm935_vm2, %v4116_v38 }
  0xf8   :  { %v2659_v52 = vadd.f32 %v2658_v51, %v2657_v49  ;;  %3964 = vmatprep.mubr.msk.bf16.mxu1 %vm935_vm2, %v4117_v44  ;;  %v4108_v49 = vld [vmem:[%s5089_s0 + $0x208] sm:$0xff]  }
  0xf9   :  { %v3730_v54 = vpop.f32.mrb[12].mxu0  ;;  %v4728_v21 = vpop.f32.mrb[12].mxu1 }
  0xfa   :  { %v2661_v55 = vadd.f32 %v2660_v53, %v2659_v52  ;;  %v1409_v56 = vpop.f32.mrb[13].mxu0  ;;  %v2398_v5 = vmax.f32 %v3730_v54, 0.0  ;;  %v4737_v28 = vpop.f32.mrb[13].mxu1 }
  0xfb   :  { %v2396_v60 = vmax.f32 %v1409_v56, 0.0  ;;  %v3731_v61 = vpop.f32.mrb[14].mxu0  ;;  %v4739_v31 = vpop.f32.mrb[14].mxu1 }
  0xfc   :  { %v2663_v1 = vadd.f32 %v2662_v59, %v2661_v55  ;;  %v1412_v2 = vpop.f32.mrb[15].mxu0  ;;  %v2399_v11 = vmax.f32 %v3731_v61, 0.0  ;;  %v2668_v14 = vsel %vm2640_vm3, %v2398_v5, 0.0  ;;  %v4742_v36 = vpop.f32.mrb[15].mxu1 }
  0xfd   :  { %v2664_v6 = vsel %vm2640_vm3, %v2396_v60, 0.0  ;;  %v2397_v7 = vmax.f32 %v1412_v2, 0.0 }
  0xfe   :  { %v2665_v10 = vadd.f32 %v2664_v6, %v2663_v1  ;;  %3837 = vmatmul.mubr.msk.bf16.gmra.mrb[120].mxu0 %vm935_vm2, %v4100_v57  ;;  %v2670_v22 = vsel %vm2640_vm3, %v2399_v11, 0.0 }
  0xff   :  { %v2666_v12 = vsel %vm2640_vm3, %v2397_v7, 0.0  ;;  %3840 = vmatprep.mubr.msk.bf16.mxu0 %vm935_vm2, %v4103_v62  ;;  %3965 = vmatmul.mubr.msk.bf16.gmra.mrb[116].mxu1 %vm935_vm2, %v4118_v63 }
 0x100   :  { %v2667_v13 = vadd.f32 %v2666_v12, %v2665_v10  ;;  %3968 = vmatprep.mubr.msk.bf16.mxu1 %vm935_vm2, %v4119_v4 }
 0x101   :  { %v3734_v16 = vpop.f32.mrb[16].mxu0  ;;  %v4752_v50 = vpop.f32.mrb[16].mxu1 }
 0x102   :  { %v2669_v17 = vadd.f32 %v2668_v14, %v2667_v13  ;;  %v1425_v19 = vpop.f32.mrb[17].mxu0  ;;  %v2402_v32 = vmax.f32 %v3734_v16, 0.0  ;;  %v4755_v54 = vpop.f32.mrb[17].mxu1 }
 0x103   :  { %v2400_v24 = vmax.f32 %v1425_v19, 0.0  ;;  %v3735_v25 = vpop.f32.mrb[18].mxu0  ;;  %v4757_v57 = vpop.f32.mrb[18].mxu1 }
 0x104   :  { %v2671_v29 = vadd.f32 %v2670_v22, %v2669_v17  ;;  %v1428_v30 = vpop.f32.mrb[19].mxu0  ;;  %v2403_v38 = vmax.f32 %v3735_v25, 0.0  ;;  %v2676_v44 = vsel %vm2640_vm3, %v2402_v32, 0.0  ;;  %v4760_v62 = vpop.f32.mrb[19].mxu1 }
 0x105   :  { %v2672_v34 = vsel %vm2640_vm3, %v2400_v24, 0.0  ;;  %v2401_v35 = vmax.f32 %v1428_v30, 0.0 }
 0x106   :  { %v2673_v37 = vadd.f32 %v2672_v34, %v2671_v29  ;;  %3841 = vmatmul.mubr.msk.bf16.gmra.mrb[124].mxu0 %vm935_vm2, %v4104_v20  ;;  %v2678_v51 = vsel %vm2640_vm3, %v2403_v38, 0.0 }
 0x107   :  { %v2674_v41 = vsel %vm2640_vm3, %v2401_v35, 0.0  ;;  %3844 = vmatprep.mubr.msk.bf16.mxu0 %vm935_vm2, %v4107_v26  ;;  %3969 = vmatmul.mubr.msk.bf16.gmra.mrb[120].mxu1 %vm935_vm2, %v4120_v27 }
 0x108   :  { %v2675_v42 = vadd.f32 %v2674_v41, %v2673_v37  ;;  %3976 = vmatprep.mubr.msk.bf16.mxu1 %vm4149_vm5, %v4148_v39 }
 0x109   :  { %v3738_v45 = vpop.f32.mrb[20].mxu0  ;;  %v4765_v11 = vpop.f32.mrb[20].mxu1 }
 0x10a   :  { %v2677_v46 = vadd.f32 %v2676_v44, %v2675_v42  ;;  %v1441_v47 = vpop.f32.mrb[21].mxu0  ;;  %v2406_v59 = vmax.f32 %v3738_v45, 0.0  ;;  %v4768_v16 = vpop.f32.mrb[21].mxu1 }
 0x10b   :  { %v2404_v52 = vmax.f32 %v1441_v47, 0.0  ;;  %v3739_v53 = vpop.f32.mrb[22].mxu0  ;;  %v4770_v20 = vpop.f32.mrb[22].mxu1 }
 0x10c   :  { %v2679_v55 = vadd.f32 %v2678_v51, %v2677_v46  ;;  %v1444_v56 = vpop.f32.mrb[23].mxu0  ;;  %v2407_v1 = vmax.f32 %v3739_v53, 0.0  ;;  %v2684_v5 = vsel %vm2640_vm3, %v2406_v59, 0.0  ;;  %v4773_v26 = vpop.f32.mrb[23].mxu1 }
 0x10d   :  { %v2680_v60 = vsel %vm2640_vm3, %v2404_v52, 0.0  ;;  %v2405_v61 = vmax.f32 %v1444_v56, 0.0 }
 0x10e   :  { %v2681_v63 = vadd.f32 %v2680_v60, %v2679_v55  ;;  %3845 = vmatmul.mubr.msk.bf16.gmra.mrb[128].mxu0 %vm935_vm2, %v4108_v49  ;;  %v2686_v12 = vsel %vm2640_vm3, %v2407_v1, 0.0 }
 0x10f   :  { %v2682_v2 = vsel %vm2640_vm3, %v2405_v61, 0.0 }
 0x110   :  { %v2683_v4 = vadd.f32 %v2682_v2, %v2681_v63 }
 0x111   :  { %v3742_v6 = vpop.f32.mrb[24].mxu0  ;;  %v4777_v41 = vpop.f32.mrb[24].mxu1 }
 0x112   :  { %v2685_v7 = vadd.f32 %v2684_v5, %v2683_v4  ;;  %v1457_v10 = vpop.f32.mrb[25].mxu0  ;;  %v2410_v22 = vmax.f32 %v3742_v6, 0.0  ;;  %v4780_v46 = vpop.f32.mrb[25].mxu1 }
 0x113   :  { %v2408_v13 = vmax.f32 %v1457_v10, 0.0  ;;  %v3743_v14 = vpop.f32.mrb[26].mxu0  ;;  %v4782_v51 = vpop.f32.mrb[26].mxu1 }
 0x114   :  { %v2687_v17 = vadd.f32 %v2686_v12, %v2685_v7  ;;  %v1460_v19 = vpop.f32.mrb[27].mxu0  ;;  %v2411_v29 = vmax.f32 %v3743_v14, 0.0  ;;  %v2692_v34 = vsel %vm2640_vm3, %v2410_v22, 0.0  ;;  %v4785_v56 = vpop.f32.mrb[27].mxu1 }
 0x115   :  { %v2688_v24 = vsel %vm2640_vm3, %v2408_v13, 0.0  ;;  %v2409_v25 = vmax.f32 %v1460_v19, 0.0 }
 0x116   :  { %v2689_v27 = vadd.f32 %v2688_v24, %v2687_v17  ;;  %v2694_v42 = vsel %vm2640_vm3, %v2411_v29, 0.0 }
 0x117   :  { %v2690_v30 = vsel %vm2640_vm3, %v2409_v25, 0.0 }
 0x118   :  { %v2691_v32 = vadd.f32 %v2690_v30, %v2689_v27 }
 0x119   :  { %v3746_v35 = vpop.f32.mrb[28].mxu0  ;;  %v3878_v6 = vpop.f32.mrb[28].mxu1 }
 0x11a   :  { %v2693_v37 = vadd.f32 %v2692_v34, %v2691_v32  ;;  %v1473_v38 = vpop.f32.mrb[29].mxu0  ;;  %v2414_v52 = vmax.f32 %v3746_v35, 0.0  ;;  %v2001_v13 = vpop.f32.mrb[29].mxu1  ;;  %v2546_v19 = vmax.f32 %v3878_v6, 0.0 }
 0x11b   :  { %v2412_v44 = vmax.f32 %v1473_v38, 0.0  ;;  %v3747_v45 = vpop.f32.mrb[30].mxu0  ;;  %v2544_v22 = vmax.f32 %v2001_v13, 0.0  ;;  %v3879_v24 = vpop.f32.mrb[30].mxu1 }
 0x11c   :  { %v2695_v47 = vadd.f32 %v2694_v42, %v2693_v37  ;;  %v1476_v49 = vpop.f32.mrb[31].mxu0  ;;  %v2415_v60 = vmax.f32 %v3747_v45, 0.0  ;;  %v2700_v1 = vsel %vm2640_vm3, %v2414_v52, 0.0  ;;  %v2004_v29 = vpop.f32.mrb[31].mxu1  ;;  %v2547_v38 = vmax.f32 %v3879_v24, 0.0 }
 0x11d   :  { %v2696_v53 = vsel %vm2640_vm3, %v2412_v44, 0.0  ;;  %v2413_v55 = vmax.f32 %v1476_v49, 0.0  ;;  %v2986_v30 = vsel %vm2640_vm3, %v2544_v22, 0.0  ;;  %v2545_v32 = vmax.f32 %v2004_v29, 0.0 }
 0x11e   :  { %v2697_v59 = vadd.f32 %v2696_v53, %v2695_v47  ;;  %v2702_v7 = vsel %vm2640_vm3, %v2415_v60, 0.0  ;;  %v2989_v44 = vsel %vm2640_vm3, %v2546_v19, 0.0 }
 0x11f   :  { %v2698_v61 = vsel %vm2640_vm3, %v2413_v55, 0.0  ;;  %v2987_v45 = vsel %vm2640_vm3, %v2545_v32, 0.0 }
 0x120   :  { %v2699_v63 = vadd.f32 %v2698_v61, %v2697_v59  ;;  %v2988_v52 = vadd.f32 %v2987_v45, %v2986_v30 }
 0x121   :  { %v3750_v2 = vpop.f32.mrb[32].mxu0  ;;  %v3882_v59 = vpop.f32.mrb[32].mxu1 }
 0x122   :  { %v2701_v4 = vadd.f32 %v2700_v1, %v2699_v63  ;;  %v1489_v5 = vpop.f32.mrb[33].mxu0  ;;  %v2418_v25 = vmax.f32 %v3750_v2, 0.0  ;;  %v2991_v1 = vsel %vm2640_vm3, %v2547_v38, 0.0  ;;  %v2990_v2 = vadd.f32 %v2989_v44, %v2988_v52 }
 0x123   :  { %v2416_v10 = vmax.f32 %v1489_v5, 0.0  ;;  %v3751_v12 = vpop.f32.mrb[34].mxu0  ;;  %v2550_v24 = vmax.f32 %v3882_v59, 0.0 }
 0x124   :  { %v4790_v14 = vadd.f32 %v2702_v7, %v2701_v4  ;;  %v1492_v17 = vpop.f32.mrb[35].mxu0  ;;  %v2419_v35 = vmax.f32 %v3751_v12, 0.0  ;;  %v2713_v47 = vsel %vm2640_vm3, %v2418_v25, 0.0  ;;  %v2017_v4 = vpop.f32.mrb[33].mxu1  ;;  %v2992_v25 = vadd.f32 %v2991_v1, %v2990_v2 }
 0x125   :  { %v2417_v27 = vmax.f32 %v1492_v17, 0.0  ;;  %v2710_v34 = vsel %vm2640_vm3, %v2416_v10, 0.0  ;;  %v3883_v7 = vpop.f32.mrb[34].mxu1  ;;  %v2548_v17 = vmax.f32 %v2017_v4, 0.0 }
 0x126   :  { %v2715_v60 = vsel %vm2640_vm3, %v2419_v35, 0.0  ;;  %v2020_v19 = vpop.f32.mrb[35].mxu1 }
 0x127   :  { %v2711_v37 = vsel %vm2640_vm3, %v2417_v27, 0.0  ;;  %v2993_v30 = vsel %vm2640_vm3, %v2548_v17, 0.0  ;;  %v2549_v32 = vmax.f32 %v2020_v19, 0.0 }
 0x128   :  { %v2712_v42 = vadd.f32 %v2711_v37, %v2710_v34  ;;  %v2994_v35 = vadd.f32 %v2993_v30, %v2992_v25  ;;  %v2551_v37 = vmax.f32 %v3883_v7, 0.0 }
 0x129   :  { %v3754_v49 = vpop.f32.mrb[36].mxu0  ;;  %v2995_v44 = vsel %vm2640_vm3, %v2549_v32, 0.0 }
 0x12a   :  { %v2714_v53 = vadd.f32 %v2713_v47, %v2712_v42  ;;  %v1505_v55 = vpop.f32.mrb[37].mxu0  ;;  %v2422_v10 = vmax.f32 %v3754_v49, 0.0  ;;  %v2997_v49 = vsel %vm2640_vm3, %v2550_v24, 0.0  ;;  %v2996_v52 = vadd.f32 %v2995_v44, %v2994_v35 }
 0x12b   :  { %v2420_v61 = vmax.f32 %v1505_v55, 0.0  ;;  %v3755_v63 = vpop.f32.mrb[38].mxu0  ;;  %v2999_v2 = vsel %vm2640_vm3, %v2551_v37, 0.0 }
 0x12c   :  { %v2716_v5 = vadd.f32 %v2715_v60, %v2714_v53  ;;  %v1508_v6 = vpop.f32.mrb[39].mxu0  ;;  %v2423_v27 = vmax.f32 %v3755_v63, 0.0  ;;  %v2721_v38 = vsel %vm2640_vm3, %v2422_v10, 0.0  ;;  %v3886_v53 = vpop.f32.mrb[36].mxu1  ;;  %v2998_v10 = vadd.f32 %v2997_v49, %v2996_v52 }
 0x12d   :  { %v2717_v12 = vsel %vm2640_vm3, %v2420_v61, 0.0  ;;  %v2421_v13 = vmax.f32 %v1508_v6, 0.0  ;;  %v2033_v61 = vpop.f32.mrb[37].mxu1  ;;  %v2554_v17 = vmax.f32 %v3886_v53, 0.0 }
 0x12e   :  { %v2718_v22 = vadd.f32 %v2717_v12, %v2716_v5  ;;  %v2723_v55 = vsel %vm2640_vm3, %v2423_v27, 0.0  ;;  %v3887_v4 = vpop.f32.mrb[38].mxu1  ;;  %v2552_v19 = vmax.f32 %v2033_v61, 0.0  ;;  %v3000_v25 = vadd.f32 %v2999_v2, %v2998_v10 }
 0x12f   :  { %v2719_v29 = vsel %vm2640_vm3, %v2421_v13, 0.0  ;;  %v2036_v12 = vpop.f32.mrb[39].mxu1  ;;  %v2555_v32 = vmax.f32 %v3887_v4, 0.0 }
 0x130   :  { %v2720_v34 = vadd.f32 %v2719_v29, %v2718_v22  ;;  %v2553_v27 = vmax.f32 %v2036_v12, 0.0  ;;  %v3001_v30 = vsel %vm2640_vm3, %v2552_v19, 0.0 }
 0x131   :  { %v3758_v42 = vpop.f32.mrb[40].mxu0  ;;  %v3002_v37 = vadd.f32 %v3001_v30, %v3000_v25 }
 0x132   :  { %v2722_v45 = vadd.f32 %v2721_v38, %v2720_v34  ;;  %v1521_v47 = vpop.f32.mrb[41].mxu0  ;;  %v2426_v5 = vmax.f32 %v3758_v42, 0.0  ;;  %v3003_v38 = vsel %vm2640_vm3, %v2553_v27, 0.0 }
 0x133   :  { %v2424_v59 = vmax.f32 %v1521_v47, 0.0  ;;  %v3759_v60 = vpop.f32.mrb[42].mxu0  ;;  %v3890_v47 = vpop.f32.mrb[40].mxu1 }
 0x134   :  { %v2724_v63 = vadd.f32 %v2723_v55, %v2722_v45  ;;  %v1524_v1 = vpop.f32.mrb[43].mxu0  ;;  %v2427_v22 = vmax.f32 %v3759_v60, 0.0  ;;  %v2729_v34 = vsel %vm2640_vm3, %v2426_v5, 0.0  ;;  %v3005_v45 = vsel %vm2640_vm3, %v2554_v17, 0.0 }
 0x135   :  { %v2725_v6 = vsel %vm2640_vm3, %v2424_v59, 0.0  ;;  %v2425_v7 = vmax.f32 %v1524_v1, 0.0  ;;  %v3004_v55 = vadd.f32 %v3003_v38, %v3002_v37  ;;  %v2049_v59 = vpop.f32.mrb[41].mxu1 }
 0x136   :  { %v2726_v13 = vadd.f32 %v2725_v6, %v2724_v63  ;;  %v2731_v49 = vsel %vm2640_vm3, %v2427_v22, 0.0  ;;  %v3007_v63 = vsel %vm2640_vm3, %v2555_v32, 0.0  ;;  %v2556_v1 = vmax.f32 %v2049_v59, 0.0  ;;  %v3891_v2 = vpop.f32.mrb[42].mxu1 }
 0x137   :  { %v2727_v24 = vsel %vm2640_vm3, %v2425_v7, 0.0  ;;  %v3006_v7 = vadd.f32 %v3005_v45, %v3004_v55  ;;  %v2052_v10 = vpop.f32.mrb[43].mxu1  ;;  %v4122_v45 = vld [vmem:[%s5091_s2 + $0x8] sm:$0xff]  }
 0x138   :  { %v2728_v29 = vadd.f32 %v2727_v24, %v2726_v13  ;;  %v2558_v13 = vmax.f32 %v3890_v47, 0.0  ;;  %v3009_v17 = vsel %vm2640_vm3, %v2556_v1, 0.0  ;;  %v2557_v25 = vmax.f32 %v2052_v10, 0.0  ;;  %3975 = vmatpush3.bf16.msra.mxu1 %v4122_v45 }
 0x139   :  { %v3762_v35 = vpop.f32.mrb[44].mxu0  ;;  %v3008_v24 = vadd.f32 %v3007_v63, %v3006_v7 }
 0x13a   :  { %v2730_v42 = vadd.f32 %v2729_v34, %v2728_v29  ;;  %v1537_v44 = vpop.f32.mrb[45].mxu0  ;;  %v2430_v4 = vmax.f32 %v3762_v35, 0.0  ;;  %v2559_v29 = vmax.f32 %v3891_v2, 0.0  ;;  %v3011_v35 = vsel %vm2640_vm3, %v2557_v25, 0.0 }
 0x13b   :  { %v2428_v52 = vmax.f32 %v1537_v44, 0.0  ;;  %v3763_v53 = vpop.f32.mrb[46].mxu0  ;;  %v3010_v34 = vadd.f32 %v3009_v17, %v3008_v24  ;;  %v3894_v44 = vpop.f32.mrb[44].mxu1 }
 0x13c   :  { %v2732_v60 = vadd.f32 %v2731_v49, %v2730_v42  ;;  %v1540_v61 = vpop.f32.mrb[47].mxu0  ;;  %v2431_v19 = vmax.f32 %v3763_v53, 0.0  ;;  %v2737_v30 = vsel %vm2640_vm3, %v2430_v4, 0.0  ;;  %v3013_v42 = vsel %vm2640_vm3, %v2558_v13, 0.0  ;;  %v2065_v55 = vpop.f32.mrb[45].mxu1 }
 0x13d   :  { %v2733_v5 = vsel %vm2640_vm3, %v2428_v52, 0.0  ;;  %v2429_v6 = vmax.f32 %v1540_v61, 0.0  ;;  %v3012_v53 = vadd.f32 %v3011_v35, %v3010_v34  ;;  %v3015_v61 = vsel %vm2640_vm3, %v2559_v29, 0.0  ;;  %v3895_v1 = vpop.f32.mrb[46].mxu1 }
 0x13e   :  { %v2734_v12 = vadd.f32 %v2733_v5, %v2732_v60  ;;  %v2739_v47 = vsel %vm2640_vm3, %v2431_v19, 0.0  ;;  %v2560_v63 = vmax.f32 %v2065_v55, 0.0  ;;  %v2068_v7 = vpop.f32.mrb[47].mxu1 }
 0x13f   :  { %v2735_v22 = vsel %vm2640_vm3, %v2429_v6, 0.0  ;;  %v3014_v6 = vadd.f32 %v3013_v42, %v3012_v53  ;;  %v2561_v24 = vmax.f32 %v2068_v7, 0.0 }
 0x140   :  { %v2736_v27 = vadd.f32 %v2735_v22, %v2734_v12  ;;  %v2562_v12 = vmax.f32 %v3894_v44, 0.0  ;;  %v3017_v13 = vsel %vm2640_vm3, %v2560_v63, 0.0 }
 0x141   :  { %v3766_v32 = vpop.f32.mrb[48].mxu0  ;;  %v3016_v22 = vadd.f32 %v3015_v61, %v3014_v6  ;;  %v3019_v34 = vsel %vm2640_vm3, %v2561_v24, 0.0  ;;  %v3898_v42 = vpop.f32.mrb[48].mxu1 }
 0x142   :  { %v2738_v37 = vadd.f32 %v2737_v30, %v2736_v27  ;;  %v1553_v38 = vpop.f32.mrb[49].mxu0  ;;  %v2434_v2 = vmax.f32 %v3766_v32, 0.0  ;;  %v2563_v27 = vmax.f32 %v3895_v1, 0.0  ;;  %v2566_v7 = vmax.f32 %v3898_v42, 0.0 }
 0x143   :  { %v2432_v49 = vmax.f32 %v1553_v38, 0.0  ;;  %v3767_v52 = vpop.f32.mrb[50].mxu0  ;;  %v3018_v32 = vadd.f32 %v3017_v13, %v3016_v22  ;;  %v3021_v38 = vsel %vm2640_vm3, %v2562_v12, 0.0 }
 0x144   :  { %v2740_v59 = vadd.f32 %v2739_v47, %v2738_v37  ;;  %v1556_v60 = vpop.f32.mrb[51].mxu0  ;;  %v2435_v17 = vmax.f32 %v3767_v52, 0.0  ;;  %v2745_v29 = vsel %vm2640_vm3, %v2434_v2, 0.0  ;;  %v2081_v52 = vpop.f32.mrb[49].mxu1 }
 0x145   :  { %v2741_v4 = vsel %vm2640_vm3, %v2432_v49, 0.0  ;;  %v2433_v5 = vmax.f32 %v1556_v60, 0.0  ;;  %v3020_v49 = vadd.f32 %v3019_v34, %v3018_v32  ;;  %v2564_v60 = vmax.f32 %v2081_v52, 0.0  ;;  %v3899_v61 = vpop.f32.mrb[50].mxu1 }
 0x146   :  { %v2742_v10 = vadd.f32 %v2741_v4, %v2740_v59  ;;  %v2747_v44 = vsel %vm2640_vm3, %v2435_v17, 0.0  ;;  %v3023_v59 = vsel %vm2640_vm3, %v2563_v27, 0.0  ;;  %v2567_v24 = vmax.f32 %v3899_v61, 0.0 }
 0x147   :  { %v2743_v19 = vsel %vm2640_vm3, %v2433_v5, 0.0  ;;  %v3022_v4 = vadd.f32 %v3021_v38, %v3020_v49  ;;  %v2084_v5 = vpop.f32.mrb[51].mxu1  ;;  %v2704_v49 = vrot.slane %v4790_v14, 4 }
 0x148   :  { %v2744_v25 = vadd.f32 %v2743_v19, %v2742_v10  ;;  %v3025_v10 = vsel %vm2640_vm3, %v2564_v60, 0.0  ;;  %v2565_v19 = vmax.f32 %v2084_v5, 0.0 }
 0x149   :  { %v3770_v30 = vpop.f32.mrb[52].mxu0  ;;  %v3024_v17 = vadd.f32 %v3023_v59, %v3022_v4 }
 0x14a   :  { %v2746_v35 = vadd.f32 %v2745_v29, %v2744_v25  ;;  %v1569_v37 = vpop.f32.mrb[53].mxu0  ;;  %v2438_v63 = vmax.f32 %v3770_v30, 0.0  ;;  %v3027_v30 = vsel %vm2640_vm3, %v2565_v19, 0.0  ;;  %v2705_v19 = vadd.f32 %v2704_v49, %v4790_v14 }
 0x14b   :  { %v2436_v45 = vmax.f32 %v1569_v37, 0.0  ;;  %v3771_v47 = vpop.f32.mrb[54].mxu0  ;;  %v3026_v29 = vadd.f32 %v3025_v10, %v3024_v17 }
 0x14c   :  { %v2748_v53 = vadd.f32 %v2747_v44, %v2746_v35  ;;  %v1572_v55 = vpop.f32.mrb[55].mxu0  ;;  %v2439_v12 = vmax.f32 %v3771_v47, 0.0  ;;  %v2753_v25 = vsel %vm2640_vm3, %v2438_v63, 0.0  ;;  %v3029_v35 = vsel %vm2640_vm3, %v2566_v7, 0.0 }
 0x14d   :  { %v2749_v1 = vsel %vm2640_vm3, %v2436_v45, 0.0  ;;  %v2437_v2 = vmax.f32 %v1572_v55, 0.0  ;;  %v3028_v45 = vadd.f32 %v3027_v30, %v3026_v29  ;;  %v3031_v55 = vsel %vm2640_vm3, %v2567_v24, 0.0 }
 0x14e   :  { %v2750_v6 = vadd.f32 %v2749_v1, %v2748_v53  ;;  %v2755_v38 = vsel %vm2640_vm3, %v2439_v12, 0.0  ;;  %v2706_v14 = vrot.slane %v2705_v19, 2 }
 0x14f   :  { %v2751_v13 = vsel %vm2640_vm3, %v2437_v2, 0.0  ;;  %v3030_v2 = vadd.f32 %v3029_v35, %v3028_v45 }
 0x150   :  { %v2752_v22 = vadd.f32 %v2751_v13, %v2750_v6 }
 0x151   :  { %v3774_v27 = vpop.f32.mrb[56].mxu0  ;;  %v3032_v13 = vadd.f32 %v3031_v55, %v3030_v2 }
 0x152   :  { %v2754_v32 = vadd.f32 %v2753_v25, %v2752_v22  ;;  %v1585_v34 = vpop.f32.mrb[57].mxu0  ;;  %v3902_v37 = vpop.f32.mrb[52].mxu1  ;;  %v2442_v61 = vmax.f32 %v3774_v27, 0.0 }
 0x153   :  { %v2440_v42 = vmax.f32 %v1585_v34, 0.0  ;;  %v3775_v44 = vpop.f32.mrb[58].mxu0  ;;  %v2097_v47 = vpop.f32.mrb[53].mxu1  ;;  %v2570_v6 = vmax.f32 %v3902_v37, 0.0 }
 0x154   :  { %v2756_v52 = vadd.f32 %v2755_v38, %v2754_v32  ;;  %v1588_v53 = vpop.f32.mrb[59].mxu0  ;;  %v2568_v59 = vmax.f32 %v2097_v47, 0.0  ;;  %v3903_v60 = vpop.f32.mrb[54].mxu1  ;;  %v2443_v10 = vmax.f32 %v3775_v44, 0.0  ;;  %v2761_v25 = vsel %vm2640_vm3, %v2442_v61, 0.0 }
 0x155   :  { %v2757_v63 = vsel %vm2640_vm3, %v2440_v42, 0.0  ;;  %v2441_v1 = vmax.f32 %v1588_v53, 0.0  ;;  %v2100_v4 = vpop.f32.mrb[55].mxu1  ;;  %v2571_v24 = vmax.f32 %v3903_v60, 0.0  ;;  %v3037_v35 = vsel %vm2640_vm3, %v2570_v6, 0.0 }
 0x156   :  { %v2758_v5 = vadd.f32 %v2757_v63, %v2756_v52  ;;  %v3033_v7 = vsel %vm2640_vm3, %v2568_v59, 0.0  ;;  %v2569_v17 = vmax.f32 %v2100_v4, 0.0  ;;  %v2763_v38 = vsel %vm2640_vm3, %v2443_v10, 0.0 }
 0x157   :  { %v2759_v12 = vsel %vm2640_vm3, %v2441_v1, 0.0  ;;  %v3034_v29 = vadd.f32 %v3033_v7, %v3032_v13  ;;  %v3039_v53 = vsel %vm2640_vm3, %v2571_v24, 0.0  ;;  %v2707_v24 = vadd.f32 %v2706_v14, %v2705_v19 }
 0x158   :  { %v2760_v22 = vadd.f32 %v2759_v12, %v2758_v5  ;;  %v3035_v30 = vsel %vm2640_vm3, %v2569_v17, 0.0 }
 0x159   :  { %v3778_v27 = vpop.f32.mrb[60].mxu0  ;;  %v3036_v45 = vadd.f32 %v3035_v30, %v3034_v29 }
 0x15a   :  { %v2762_v32 = vadd.f32 %v2761_v25, %v2760_v22  ;;  %v1601_v34 = vpop.f32.mrb[61].mxu0  ;;  %v3906_v37 = vpop.f32.mrb[56].mxu1  ;;  %v2446_v60 = vmax.f32 %v3778_v27, 0.0 }
 0x15b   :  { %v2444_v42 = vmax.f32 %v1601_v34, 0.0  ;;  %v3779_v44 = vpop.f32.mrb[62].mxu0  ;;  %v2113_v47 = vpop.f32.mrb[57].mxu1  ;;  %v3038_v1 = vadd.f32 %v3037_v35, %v3036_v45  ;;  %v2574_v5 = vmax.f32 %v3906_v37, 0.0 }
 0x15c   :  { %v2764_v49 = vadd.f32 %v2763_v38, %v2762_v32  ;;  %v1604_v52 = vpop.f32.mrb[63].mxu0  ;;  %v2572_v55 = vmax.f32 %v2113_v47, 0.0  ;;  %v3907_v59 = vpop.f32.mrb[58].mxu1  ;;  %v2447_v7 = vmax.f32 %v3779_v44, 0.0  ;;  %v2769_v25 = vsel %vm2640_vm3, %v2446_v60, 0.0 }
 0x15d   :  { %v2765_v61 = vsel %vm2640_vm3, %v2444_v42, 0.0  ;;  %v2445_v63 = vmax.f32 %v1604_v52, 0.0  ;;  %v2116_v2 = vpop.f32.mrb[59].mxu1  ;;  %v3040_v12 = vadd.f32 %v3039_v53, %v3038_v1  ;;  %v2575_v22 = vmax.f32 %v3907_v59, 0.0 }
 0x15e   :  { %v2766_v4 = vadd.f32 %v2765_v61, %v2764_v49  ;;  %v3041_v6 = vsel %vm2640_vm3, %v2572_v55, 0.0  ;;  %v2573_v13 = vmax.f32 %v2116_v2, 0.0  ;;  %v3045_v35 = vsel %vm2640_vm3, %v2574_v5, 0.0 }
 0x15f   :  { %v2767_v10 = vsel %vm2640_vm3, %v2445_v63, 0.0  ;;  %v3042_v29 = vadd.f32 %v3041_v6, %v3040_v12  ;;  %v2771_v38 = vsel %vm2640_vm3, %v2447_v7, 0.0  ;;  %v3047_v19 = vsel %vm2640_vm3, %v2575_v22, 0.0 }
 0x160   :  { %v2768_v17 = vadd.f32 %v2767_v10, %v2766_v4  ;;  %v3043_v30 = vsel %vm2640_vm3, %v2573_v13, 0.0  ;;  %v2708_v55 = vrot.slane %v2707_v24, 1 }
 0x161   :  { %v3782_v27 = vpop.f32.mrb[64].mxu0  ;;  %v3044_v45 = vadd.f32 %v3043_v30, %v3042_v29 }
 0x162   :  { %v2770_v32 = vadd.f32 %v2769_v25, %v2768_v17  ;;  %v1617_v34 = vpop.f32.mrb[65].mxu0  ;;  %v3910_v37 = vpop.f32.mrb[60].mxu1  ;;  %v2450_v59 = vmax.f32 %v3782_v27, 0.0  ;;  %v2709_v25 = vadd.f32 %v2708_v55, %v2707_v24 }
 0x163   :  { %v2448_v42 = vmax.f32 %v1617_v34, 0.0  ;;  %v3783_v44 = vpop.f32.mrb[66].mxu0  ;;  %v2129_v47 = vpop.f32.mrb[61].mxu1  ;;  %v3046_v61 = vadd.f32 %v3045_v35, %v3044_v45  ;;  %v2578_v5 = vmax.f32 %v3910_v37, 0.0 }
 0x164   :  { %v2772_v49 = vadd.f32 %v2771_v38, %v2770_v32  ;;  %v1620_v52 = vpop.f32.mrb[67].mxu0  ;;  %v2576_v14 = vmax.f32 %v2129_v47, 0.0  ;;  %v3911_v53 = vpop.f32.mrb[62].mxu1  ;;  %v2451_v4 = vmax.f32 %v3783_v44, 0.0  ;;  %v2782_v27 = vsel %vm2640_vm3, %v2450_v59, 0.0 }
 0x165   :  { %v2449_v60 = vmax.f32 %v1620_v52, 0.0  ;;  %v2132_v63 = vpop.f32.mrb[63].mxu1  ;;  %v2779_v2 = vsel %vm2640_vm3, %v2448_v42, 0.0  ;;  %v4863_v7 = vadd.f32 %v3047_v19, %v3046_v61  ;;  %v2579_v22 = vmax.f32 %v3911_v53, 0.0 }
 0x166   :  { %v2773_v1 = vrot.slane %v2772_v49, 4  ;;  %v3055_v10 = vsel %vm2640_vm3, %v2576_v14, 0.0  ;;  %v2577_v12 = vmax.f32 %v2132_v63, 0.0  ;;  %v3058_v37 = vsel %vm2640_vm3, %v2578_v5, 0.0 }
 0x167   :  { %v2780_v6 = vsel %vm2640_vm3, %v2449_v60, 0.0  ;;  %v2784_v44 = vsel %vm2640_vm3, %v2451_v4, 0.0  ;;  %v3060_v14 = vsel %vm2640_vm3, %v2579_v22, 0.0 }
 0x168   :  { %v2774_v13 = vadd.f32 %v2773_v1, %v2772_v49  ;;  %v2781_v17 = vadd.f32 %v2780_v6, %v2779_v2  ;;  %v3056_v30 = vsel %vm2640_vm3, %v2577_v12, 0.0  ;;  %v3193_v1 = vpack.c.bf16 %v2709_v25, %v2709_v25 }
 0x169   :  { %v3786_v29 = vpop.f32.mrb[68].mxu0  ;;  %v3057_v38 = vadd.f32 %v3056_v30, %v3055_v10 }
 0x16a   :  { %v2775_v32 = vrot.slane %v2774_v13, 2  ;;  %v2783_v34 = vadd.f32 %v2782_v27, %v2781_v17  ;;  %v1633_v35 = vpop.f32.mrb[69].mxu0  ;;  %v3914_v42 = vpop.f32.mrb[64].mxu1  ;;  %v2454_v55 = vmax.f32 %v3786_v29, 0.0 }
 0x16b   :  { %v2452_v45 = vmax.f32 %v1633_v35, 0.0  ;;  %v3787_v47 = vpop.f32.mrb[70].mxu0  ;;  %v2145_v49 = vpop.f32.mrb[65].mxu1  ;;  %v3059_v61 = vadd.f32 %v3058_v37, %v3057_v38  ;;  %v2582_v27 = vmax.f32 %v3914_v42, 0.0 }
 0x16c   :  { %v2776_v52 = vadd.f32 %v2775_v32, %v2774_v13  ;;  %v2785_v19 = vadd.f32 %v2784_v44, %v2783_v34  ;;  %v1636_v24 = vpop.f32.mrb[71].mxu0  ;;  %v3915_v53 = vpop.f32.mrb[66].mxu1  ;;  %v2455_v6 = vmax.f32 %v3787_v47, 0.0  ;;  %v2580_v10 = vmax.f32 %v2145_v49, 0.0 }
 0x16d   :  { %v2786_v59 = vsel %vm2640_vm3, %v2452_v45, 0.0  ;;  %v2453_v60 = vmax.f32 %v1636_v24, 0.0  ;;  %v2148_v63 = vpop.f32.mrb[67].mxu1  ;;  %v3061_v12 = vadd.f32 %v3060_v14, %v3059_v61  ;;  %v2790_v22 = vsel %vm2640_vm3, %v2454_v55, 0.0 }
 0x16e   :  { %v2777_v2 = vrot.slane %v2776_v52, 1  ;;  %v2787_v5 = vadd.f32 %v2786_v59, %v2785_v19  ;;  %v2581_v30 = vmax.f32 %v2148_v63, 0.0  ;;  %v3062_v32 = vsel %vm2640_vm3, %v2580_v10, 0.0 }
 0x16f   :  { %v2788_v4 = vsel %vm2640_vm3, %v2453_v60, 0.0  ;;  %v3063_v25 = vadd.f32 %v3062_v32, %v3061_v12  ;;  %v2583_v38 = vmax.f32 %v3915_v53, 0.0  ;;  %v2792_v45 = vsel %vm2640_vm3, %v2455_v6, 0.0 }
 0x170   :  { %v2778_v13 = vadd.f32 %v2777_v2, %v2776_v52  ;;  %v2789_v17 = vadd.f32 %v2788_v4, %v2787_v5  ;;  %v3064_v52 = vsel %vm2640_vm3, %v2581_v30, 0.0  ;;  %v3220_v19 = vunpack.c.l.b16 %v3193_v1 }
 0x171   :  { %v3790_v29 = vpop.f32.mrb[72].mxu0  ;;  %v3066_v59 = vsel %vm2640_vm3, %v2582_v27, 0.0  ;;  %v3065_v2 = vadd.f32 %v3064_v52, %v3063_v25  ;;  %v3068_v10 = vsel %vm2640_vm3, %v2583_v38, 0.0 }
 0x172   :  { %v3194_v34 = vpack.c.bf16 %v2778_v13, %v2778_v13  ;;  %v2791_v35 = vadd.f32 %v2790_v22, %v2789_v17  ;;  %v1649_v37 = vpop.f32.mrb[73].mxu0  ;;  %v3918_v44 = vpop.f32.mrb[68].mxu1  ;;  %v2458_v61 = vmax.f32 %v3790_v29, 0.0 }
 0x173   :  { %v2456_v47 = vmax.f32 %v1649_v37, 0.0  ;;  %v3791_v49 = vpop.f32.mrb[74].mxu0  ;;  %v2161_v42 = vpop.f32.mrb[69].mxu1  ;;  %v3067_v13 = vadd.f32 %v3066_v59, %v3065_v2  ;;  %v2586_v27 = vmax.f32 %v3918_v44, 0.0 }
 0x174   :  { %v3221_v24 = vunpack.c.l.b16 %v3194_v34  ;;  %v2793_v14 = vadd.f32 %v2792_v45, %v2791_v35  ;;  %v1652_v55 = vpop.f32.mrb[75].mxu0  ;;  %v3919_v60 = vpop.f32.mrb[70].mxu1  ;;  %v2459_v12 = vmax.f32 %v3791_v49, 0.0  ;;  %v2584_v17 = vmax.f32 %v2161_v42, 0.0 }
 0x175   :  { %v2794_v63 = vsel %vm2640_vm3, %v2456_v47, 0.0  ;;  %v2457_v53 = vmax.f32 %v1652_v55, 0.0  ;;  %v2164_v5 = vpop.f32.mrb[71].mxu1  ;;  %v2798_v29 = vsel %vm2640_vm3, %v2458_v61, 0.0  ;;  %v3069_v34 = vadd.f32 %v3068_v10, %v3067_v13 }
 0x176   :  { %v4880_v6 = vsel %vm3228_vm4, %v3221_v24, %v3220_v19  ;;  %v2795_v4 = vadd.f32 %v2794_v63, %v2793_v14  ;;  %v2585_v22 = vmax.f32 %v2164_v5, 0.0  ;;  %v3070_v35 = vsel %vm2640_vm3, %v2584_v17, 0.0 }
 0x177   :  { %v2796_v1 = vsel %vm2640_vm3, %v2457_v53, 0.0  ;;  %v2587_v45 = vmax.f32 %v3919_v60, 0.0  ;;  %v2800_v49 = vsel %vm2640_vm3, %v2459_v12, 0.0  ;;  %v3071_v42 = vadd.f32 %v3070_v35, %v3069_v34 }
 0x178   :  { %v2797_v30 = vadd.f32 %v2796_v1, %v2795_v4  ;;  %v3072_v47 = vsel %vm2640_vm3, %v2585_v22, 0.0  ;;  %v3074_v55 = vsel %vm2640_vm3, %v2586_v27, 0.0 }
 0x179   :  { %v3794_v32 = vpop.f32.mrb[76].mxu0  ;;  %v3073_v60 = vadd.f32 %v3072_v47, %v3071_v42  ;;  %v3076_v10 = vsel %vm2640_vm3, %v2587_v45, 0.0 }
 0x17a   :  { %v2799_v37 = vadd.f32 %v2798_v29, %v2797_v30  ;;  %v1665_v25 = vpop.f32.mrb[77].mxu0  ;;  %v3922_v38 = vpop.f32.mrb[72].mxu1  ;;  %v2462_v63 = vmax.f32 %v3794_v32, 0.0 }
 0x17b   :  { %v2460_v52 = vmax.f32 %v1665_v25, 0.0  ;;  %v3795_v19 = vpop.f32.mrb[78].mxu0  ;;  %v2177_v24 = vpop.f32.mrb[73].mxu1  ;;  %v3075_v13 = vadd.f32 %v3074_v55, %v3073_v60  ;;  %v2590_v22 = vmax.f32 %v3922_v38, 0.0 }
 0x17c   :  { %v2801_v44 = vadd.f32 %v2800_v49, %v2799_v37  ;;  %v1668_v14 = vpop.f32.mrb[79].mxu0  ;;  %v2588_v59 = vmax.f32 %v2177_v24, 0.0  ;;  %v3923_v61 = vpop.f32.mrb[74].mxu1  ;;  %v2463_v12 = vmax.f32 %v3795_v19, 0.0  ;;  %v2806_v29 = vsel %vm2640_vm3, %v2462_v63, 0.0 }
 0x17d   :  { %v2802_v53 = vsel %vm2640_vm3, %v2460_v52, 0.0  ;;  %v2461_v2 = vmax.f32 %v1668_v14, 0.0  ;;  %v2180_v5 = vpop.f32.mrb[75].mxu1  ;;  %v3077_v34 = vadd.f32 %v3076_v10, %v3075_v13  ;;  %v2591_v25 = vmax.f32 %v3923_v61, 0.0 }
 0x17e   :  { %v2803_v4 = vadd.f32 %v2802_v53, %v2801_v44  ;;  %v2589_v17 = vmax.f32 %v2180_v5, 0.0  ;;  %v3078_v27 = vsel %vm2640_vm3, %v2588_v59, 0.0  ;;  %v2808_v45 = vsel %vm2640_vm3, %v2463_v12, 0.0 }
 0x17f   :  { %v2804_v1 = vsel %vm2640_vm3, %v2461_v2, 0.0  ;;  %v3079_v42 = vadd.f32 %v3078_v27, %v3077_v34  ;;  %v3082_v14 = vsel %vm2640_vm3, %v2590_v22, 0.0 }
 0x180   :  { %v2805_v30 = vadd.f32 %v2804_v1, %v2803_v4  ;;  %v3080_v47 = vsel %vm2640_vm3, %v2589_v17, 0.0  ;;  %v3084_v4 = vsel %vm2640_vm3, %v2591_v25, 0.0 }
 0x181   :  { %v3798_v32 = vpop.f32.mrb[80].mxu0  ;;  %v3081_v61 = vadd.f32 %v3080_v47, %v3079_v42 }
 0x182   :  { %v2807_v35 = vadd.f32 %v2806_v29, %v2805_v30  ;;  %v1681_v37 = vpop.f32.mrb[81].mxu0  ;;  %v3926_v49 = vpop.f32.mrb[76].mxu1  ;;  %v2466_v63 = vmax.f32 %v3798_v32, 0.0 }
 0x183   :  { %v2464_v52 = vmax.f32 %v1681_v37, 0.0  ;;  %v3799_v19 = vpop.f32.mrb[82].mxu0  ;;  %v2193_v24 = vpop.f32.mrb[77].mxu1  ;;  %v3083_v1 = vadd.f32 %v3082_v14, %v3081_v61  ;;  %v2594_v30 = vmax.f32 %v3926_v49, 0.0 }
 0x184   :  { %v2809_v44 = vadd.f32 %v2808_v45, %v2807_v35  ;;  %v1684_v38 = vpop.f32.mrb[83].mxu0  ;;  %v2592_v55 = vmax.f32 %v2193_v24, 0.0  ;;  %v3927_v59 = vpop.f32.mrb[78].mxu1  ;;  %v2467_v10 = vmax.f32 %v3799_v19, 0.0  ;;  %v2814_v27 = vsel %vm2640_vm3, %v2466_v63, 0.0 }
 0x185   :  { %v2810_v53 = vsel %vm2640_vm3, %v2464_v52, 0.0  ;;  %v2465_v2 = vmax.f32 %v1684_v38, 0.0  ;;  %v2196_v60 = vpop.f32.mrb[79].mxu1  ;;  %v3085_v32 = vadd.f32 %v3084_v4, %v3083_v1  ;;  %v2595_v37 = vmax.f32 %v3927_v59, 0.0 }
 0x186   :  { %v2811_v5 = vadd.f32 %v2810_v53, %v2809_v44  ;;  %v2593_v13 = vmax.f32 %v2196_v60, 0.0  ;;  %v3086_v22 = vsel %vm2640_vm3, %v2592_v55, 0.0  ;;  %v2816_v25 = vsel %vm2640_vm3, %v2467_v10, 0.0 }
 0x187   :  { %v2812_v12 = vsel %vm2640_vm3, %v2465_v2, 0.0  ;;  %v3087_v42 = vadd.f32 %v3086_v22, %v3085_v32  ;;  %v3090_v38 = vsel %vm2640_vm3, %v2594_v30, 0.0 }
 0x188   :  { %v2813_v17 = vadd.f32 %v2812_v12, %v2811_v5  ;;  %v3088_v47 = vsel %vm2640_vm3, %v2593_v13, 0.0  ;;  %v3092_v5 = vsel %vm2640_vm3, %v2595_v37, 0.0 }
 0x189   :  { %v3802_v29 = vpop.f32.mrb[84].mxu0  ;;  %v3089_v59 = vadd.f32 %v3088_v47, %v3087_v42 }
 0x18a   :  { %v2815_v34 = vadd.f32 %v2814_v27, %v2813_v17  ;;  %v1697_v35 = vpop.f32.mrb[85].mxu0  ;;  %v3930_v45 = vpop.f32.mrb[80].mxu1  ;;  %v2470_v63 = vmax.f32 %v3802_v29, 0.0 }
 0x18b   :  { %v2468_v52 = vmax.f32 %v1697_v35, 0.0  ;;  %v3803_v19 = vpop.f32.mrb[86].mxu0  ;;  %v2209_v24 = vpop.f32.mrb[81].mxu1  ;;  %v3091_v12 = vadd.f32 %v3090_v38, %v3089_v59  ;;  %v2598_v17 = vmax.f32 %v3930_v45, 0.0 }
 0x18c   :  { %v2817_v44 = vadd.f32 %v2816_v25, %v2815_v34  ;;  %v1700_v49 = vpop.f32.mrb[87].mxu0  ;;  %v2596_v14 = vmax.f32 %v2209_v24, 0.0  ;;  %v3931_v55 = vpop.f32.mrb[82].mxu1  ;;  %v2471_v4 = vmax.f32 %v3803_v19, 0.0  ;;  %v2822_v22 = vsel %vm2640_vm3, %v2470_v63, 0.0 }
 0x18d   :  { %v2818_v53 = vsel %vm2640_vm3, %v2468_v52, 0.0  ;;  %v2469_v2 = vmax.f32 %v1700_v49, 0.0  ;;  %v2212_v61 = vpop.f32.mrb[83].mxu1  ;;  %v3093_v29 = vadd.f32 %v3092_v5, %v3091_v12  ;;  %v2599_v35 = vmax.f32 %v3931_v55, 0.0 }
 0x18e   :  { %v2819_v60 = vadd.f32 %v2818_v53, %v2817_v44  ;;  %v2597_v1 = vmax.f32 %v2212_v61, 0.0  ;;  %v3094_v30 = vsel %vm2640_vm3, %v2596_v14, 0.0  ;;  %v2824_v37 = vsel %vm2640_vm3, %v2471_v4, 0.0 }
 0x18f   :  { %v2820_v10 = vsel %vm2640_vm3, %v2469_v2, 0.0  ;;  %v3095_v42 = vadd.f32 %v3094_v30, %v3093_v29  ;;  %v3098_v49 = vsel %vm2640_vm3, %v2598_v17, 0.0  ;;  %v3100_v5 = vsel %vm2640_vm3, %v2599_v35, 0.0 }
 0x190   :  { %v2821_v13 = vadd.f32 %v2820_v10, %v2819_v60  ;;  %v3096_v47 = vsel %vm2640_vm3, %v2597_v1, 0.0 }
 0x191   :  { %v3806_v27 = vpop.f32.mrb[88].mxu0  ;;  %v3097_v55 = vadd.f32 %v3096_v47, %v3095_v42 }
 0x192   :  { %v2823_v32 = vadd.f32 %v2822_v22, %v2821_v13  ;;  %v1713_v34 = vpop.f32.mrb[89].mxu0  ;;  %v3934_v25 = vpop.f32.mrb[84].mxu1  ;;  %v2474_v63 = vmax.f32 %v3806_v27, 0.0 }
 0x193   :  { %v2472_v52 = vmax.f32 %v1713_v34, 0.0  ;;  %v3807_v19 = vpop.f32.mrb[90].mxu0  ;;  %v2225_v24 = vpop.f32.mrb[85].mxu1  ;;  %v3099_v10 = vadd.f32 %v3098_v49, %v3097_v55  ;;  %v2602_v13 = vmax.f32 %v3934_v25, 0.0 }
 0x194   :  { %v2825_v44 = vadd.f32 %v2824_v37, %v2823_v32  ;;  %v1716_v45 = vpop.f32.mrb[91].mxu0  ;;  %v2600_v38 = vmax.f32 %v2225_v24, 0.0  ;;  %v3935_v14 = vpop.f32.mrb[86].mxu1  ;;  %v2475_v60 = vmax.f32 %v3807_v19, 0.0  ;;  %v2830_v30 = vsel %vm2640_vm3, %v2474_v63, 0.0 }
 0x195   :  { %v2826_v53 = vsel %vm2640_vm3, %v2472_v52, 0.0  ;;  %v2473_v2 = vmax.f32 %v1716_v45, 0.0  ;;  %v2228_v59 = vpop.f32.mrb[87].mxu1  ;;  %v3101_v27 = vadd.f32 %v3100_v5, %v3099_v10  ;;  %v2603_v34 = vmax.f32 %v3935_v14, 0.0 }
 0x196   :  { %v2827_v61 = vadd.f32 %v2826_v53, %v2825_v44  ;;  %v2601_v12 = vmax.f32 %v2228_v59, 0.0  ;;  %v3102_v17 = vsel %vm2640_vm3, %v2600_v38, 0.0  ;;  %v2832_v37 = vsel %vm2640_vm3, %v2475_v60, 0.0 }
 0x197   :  { %v2828_v4 = vsel %vm2640_vm3, %v2473_v2, 0.0  ;;  %v3103_v25 = vadd.f32 %v3102_v17, %v3101_v27  ;;  %v3106_v39 = vsel %vm2640_vm3, %v2602_v13, 0.0  ;;  %v3108_v59 = vsel %vm2640_vm3, %v2603_v34, 0.0 }
 0x198   :  { %v2829_v1 = vadd.f32 %v2828_v4, %v2827_v61  ;;  %v3104_v35 = vsel %vm2640_vm3, %v2601_v12, 0.0 }
 0x199   :  { %v3810_v22 = vpop.f32.mrb[92].mxu0  ;;  %v3105_v14 = vadd.f32 %v3104_v35, %v3103_v25 }
 0x19a   :  { %v2831_v29 = vadd.f32 %v2830_v30, %v2829_v1  ;;  %v1729_v32 = vpop.f32.mrb[93].mxu0  ;;  %v3938_v47 = vpop.f32.mrb[88].mxu1  ;;  %v2478_v38 = vmax.f32 %v3810_v22, 0.0 }
 0x19b   :  { %v2476_v52 = vmax.f32 %v1729_v32, 0.0  ;;  %v3811_v19 = vpop.f32.mrb[94].mxu0  ;;  %v2241_v42 = vpop.f32.mrb[89].mxu1  ;;  %v3107_v5 = vadd.f32 %v3106_v39, %v3105_v14  ;;  %v2606_v12 = vmax.f32 %v3938_v47, 0.0 }
 0x19c   :  { %v2833_v24 = vadd.f32 %v2832_v37, %v2831_v29  ;;  %v1732_v44 = vpop.f32.mrb[95].mxu0  ;;  %v2604_v45 = vmax.f32 %v2241_v42, 0.0  ;;  %v3939_v49 = vpop.f32.mrb[90].mxu1  ;;  %v2479_v61 = vmax.f32 %v3811_v19, 0.0  ;;  %v2838_v13 = vsel %vm2640_vm3, %v2478_v38, 0.0 }
 0x19d   :  { %v2834_v63 = vsel %vm2640_vm3, %v2476_v52, 0.0  ;;  %v2477_v53 = vmax.f32 %v1732_v44, 0.0  ;;  %v2244_v2 = vpop.f32.mrb[91].mxu1  ;;  %v3109_v30 = vadd.f32 %v3108_v59, %v3107_v5  ;;  %v2607_v22 = vmax.f32 %v3939_v49, 0.0 }
 0x19e   :  { %v2835_v55 = vadd.f32 %v2834_v63, %v2833_v24  ;;  %v2605_v4 = vmax.f32 %v2244_v2, 0.0  ;;  %v3110_v1 = vsel %vm2640_vm3, %v2604_v45, 0.0  ;;  %v2840_v34 = vsel %vm2640_vm3, %v2479_v61, 0.0 }
 0x19f   :  { %v2836_v60 = vsel %vm2640_vm3, %v2477_v53, 0.0  ;;  %v3111_v19 = vadd.f32 %v3110_v1, %v3109_v30  ;;  %v3114_v24 = vsel %vm2640_vm3, %v2606_v12, 0.0  ;;  %v3116_v49 = vsel %vm2640_vm3, %v2607_v22, 0.0 }
 0x1a0   :  { %v2837_v10 = vadd.f32 %v2836_v60, %v2835_v55  ;;  %v3112_v32 = vsel %vm2640_vm3, %v2605_v4, 0.0 }
 0x1a1   :  { %v3814_v17 = vpop.f32.mrb[96].mxu0  ;;  %v3113_v63 = vadd.f32 %v3112_v32, %v3111_v19 }
 0x1a2   :  { %v2839_v27 = vadd.f32 %v2838_v13, %v2837_v10  ;;  %v1745_v29 = vpop.f32.mrb[97].mxu0  ;;  %v3942_v35 = vpop.f32.mrb[92].mxu1  ;;  %v2482_v45 = vmax.f32 %v3814_v17, 0.0 }
 0x1a3   :  { %v2480_v37 = vmax.f32 %v1745_v29, 0.0  ;;  %v3815_v52 = vpop.f32.mrb[98].mxu0  ;;  %v2257_v25 = vpop.f32.mrb[93].mxu1  ;;  %v2610_v59 = vmax.f32 %v3942_v35, 0.0  ;;  %v3115_v60 = vadd.f32 %v3114_v24, %v3113_v63 }
 0x1a4   :  { %v2841_v42 = vadd.f32 %v2840_v34, %v2839_v27  ;;  %v1748_v47 = vpop.f32.mrb[99].mxu0  ;;  %v2608_v44 = vmax.f32 %v2257_v25, 0.0  ;;  %v3943_v39 = vpop.f32.mrb[94].mxu1  ;;  %v2483_v55 = vmax.f32 %v3815_v52, 0.0  ;;  %v2851_v13 = vsel %vm2640_vm3, %v2482_v45, 0.0 }
 0x1a5   :  { %v2481_v38 = vmax.f32 %v1748_v47, 0.0  ;;  %v2260_v53 = vpop.f32.mrb[95].mxu1  ;;  %v2848_v2 = vsel %vm2640_vm3, %v2480_v37, 0.0  ;;  %v2611_v1 = vmax.f32 %v3943_v39, 0.0  ;;  %v4935_v30 = vadd.f32 %v3116_v49, %v3115_v60 }
 0x1a6   :  { %v2842_v14 = vrot.slane %v2841_v42, 4  ;;  %v3124_v5 = vsel %vm2640_vm3, %v2608_v44, 0.0  ;;  %v2609_v4 = vmax.f32 %v2260_v53, 0.0  ;;  %v3127_v35 = vsel %vm2640_vm3, %v2610_v59, 0.0 }
 0x1a7   :  { %v2849_v61 = vsel %vm2640_vm3, %v2481_v38, 0.0  ;;  %v2853_v52 = vsel %vm2640_vm3, %v2483_v55, 0.0  ;;  %v3129_v39 = vsel %vm2640_vm3, %v2611_v1, 0.0 }
 0x1a8   :  { %v2843_v10 = vadd.f32 %v2842_v14, %v2841_v42  ;;  %v2850_v12 = vadd.f32 %v2849_v61, %v2848_v2  ;;  %v3125_v22 = vsel %vm2640_vm3, %v2609_v4, 0.0 }
 0x1a9   :  { %v3818_v17 = vpop.f32.mrb[100].mxu0  ;;  %v3126_v34 = vadd.f32 %v3125_v22, %v3124_v5 }
 0x1aa   :  { %v2844_v27 = vrot.slane %v2843_v10, 2  ;;  %v2852_v29 = vadd.f32 %v2851_v13, %v2850_v12  ;;  %v1761_v32 = vpop.f32.mrb[101].mxu0  ;;  %v3946_v37 = vpop.f32.mrb[96].mxu1  ;;  %v2486_v38 = vmax.f32 %v3818_v17, 0.0 }
 0x1ab   :  { %v2484_v19 = vmax.f32 %v1761_v32, 0.0  ;;  %v3819_v25 = vpop.f32.mrb[102].mxu0  ;;  %v2273_v42 = vpop.f32.mrb[97].mxu1  ;;  %v3128_v53 = vadd.f32 %v3127_v35, %v3126_v34  ;;  %v2614_v12 = vmax.f32 %v3946_v37, 0.0 }
 0x1ac   :  { %v2845_v47 = vadd.f32 %v2844_v27, %v2843_v10  ;;  %v2854_v24 = vadd.f32 %v2853_v52, %v2852_v29  ;;  %v1764_v44 = vpop.f32.mrb[103].mxu0  ;;  %v3947_v45 = vpop.f32.mrb[98].mxu1  ;;  %v2487_v61 = vmax.f32 %v3819_v25, 0.0  ;;  %v2612_v60 = vmax.f32 %v2273_v42, 0.0 }
 0x1ad   :  { %v2855_v49 = vsel %vm2640_vm3, %v2484_v19, 0.0  ;;  %v2485_v63 = vmax.f32 %v1764_v44, 0.0  ;;  %v2276_v14 = vpop.f32.mrb[99].mxu1  ;;  %v3130_v5 = vadd.f32 %v3129_v39, %v3128_v53  ;;  %v2859_v1 = vsel %vm2640_vm3, %v2486_v38, 0.0 }
 0x1ae   :  { %v2846_v2 = vrot.slane %v2845_v47, 1  ;;  %v2856_v59 = vadd.f32 %v2855_v49, %v2854_v24  ;;  %v2613_v13 = vmax.f32 %v2276_v14, 0.0  ;;  %v3131_v17 = vsel %vm2640_vm3, %v2612_v60, 0.0 }
 0x1af   :  { %v2857_v55 = vsel %vm2640_vm3, %v2485_v63, 0.0  ;;  %v3132_v35 = vadd.f32 %v3131_v17, %v3130_v5  ;;  %v2615_v34 = vmax.f32 %v3947_v45, 0.0  ;;  %v2861_v19 = vsel %vm2640_vm3, %v2487_v61, 0.0 }
 0x1b0   :  { %v2847_v4 = vadd.f32 %v2846_v2, %v2845_v47  ;;  %v2858_v10 = vadd.f32 %v2857_v55, %v2856_v59  ;;  %v3133_v47 = vsel %vm2640_vm3, %v2613_v13, 0.0  ;;  %v3135_v38 = vsel %vm2640_vm3, %v2614_v12, 0.0 }
 0x1b1   :  { %v3822_v22 = vpop.f32.mrb[104].mxu0  ;;  %v3134_v45 = vadd.f32 %v3133_v47, %v3132_v35  ;;  %v3137_v55 = vsel %vm2640_vm3, %v2615_v34, 0.0 }
 0x1b2   :  { %v3195_v27 = vpack.c.bf16 %v2847_v4, %v2847_v4  ;;  %v2860_v29 = vadd.f32 %v2859_v1, %v2858_v10  ;;  %v1777_v32 = vpop.f32.mrb[105].mxu0  ;;  %v3950_v52 = vpop.f32.mrb[100].mxu1  ;;  %v2490_v63 = vmax.f32 %v3822_v22, 0.0 }
 0x1b3   :  { %v2488_v25 = vmax.f32 %v1777_v32, 0.0  ;;  %v3823_v42 = vpop.f32.mrb[106].mxu0  ;;  %v2289_v37 = vpop.f32.mrb[101].mxu1  ;;  %v3136_v4 = vadd.f32 %v3135_v38, %v3134_v45  ;;  %v2618_v13 = vmax.f32 %v3950_v52, 0.0 }
 0x1b4   :  { %v3222_v24 = vunpack.c.l.b16 %v3195_v27  ;;  %v2862_v44 = vadd.f32 %v2861_v19, %v2860_v29  ;;  %v1780_v39 = vpop.f32.mrb[107].mxu0  ;;  %v3951_v49 = vpop.f32.mrb[102].mxu1  ;;  %v2491_v60 = vmax.f32 %v3823_v42, 0.0  ;;  %v2616_v10 = vmax.f32 %v2289_v37, 0.0 }
 0x1b5   :  { %v2863_v53 = vsel %vm2640_vm3, %v2488_v25, 0.0  ;;  %v2489_v14 = vmax.f32 %v1780_v39, 0.0  ;;  %v2292_v2 = vpop.f32.mrb[103].mxu1  ;;  %v2867_v22 = vsel %vm2640_vm3, %v2490_v63, 0.0  ;;  %v3138_v27 = vadd.f32 %v3137_v55, %v3136_v4 }
 0x1b6   :  { %v4951_v59 = vsel %vm3230_vm6, %v3222_v24, %v4880_v6  ;;  %v2864_v61 = vadd.f32 %v2863_v53, %v2862_v44  ;;  %v2617_v1 = vmax.f32 %v2292_v2, 0.0  ;;  %v3139_v29 = vsel %vm2640_vm3, %v2616_v10, 0.0 }
 0x1b7   :  { %v2865_v5 = vsel %vm2640_vm3, %v2489_v14, 0.0  ;;  %v2619_v35 = vmax.f32 %v3951_v49, 0.0  ;;  %v2869_v25 = vsel %vm2640_vm3, %v2491_v60, 0.0  ;;  %v3140_v37 = vadd.f32 %v3139_v29, %v3138_v27 }
 0x1b8   :  { %v2866_v12 = vadd.f32 %v2865_v5, %v2864_v61  ;;  %v3141_v19 = vsel %vm2640_vm3, %v2617_v1, 0.0  ;;  %v3143_v39 = vsel %vm2640_vm3, %v2618_v13, 0.0 }
 0x1b9   :  { %v3826_v17 = vpop.f32.mrb[108].mxu0  ;;  %v3142_v49 = vadd.f32 %v3141_v19, %v3140_v37  ;;  %v3145_v55 = vsel %vm2640_vm3, %v2619_v35, 0.0 }
 0x1ba   :  { %v2868_v32 = vadd.f32 %v2867_v22, %v2866_v12  ;;  %v1793_v6 = vpop.f32.mrb[109].mxu0  ;;  %v3954_v34 = vpop.f32.mrb[104].mxu1  ;;  %v2494_v53 = vmax.f32 %v3826_v17, 0.0 }
 0x1bb   :  { %v2492_v42 = vmax.f32 %v1793_v6, 0.0  ;;  %v3827_v47 = vpop.f32.mrb[110].mxu0  ;;  %v2305_v24 = vpop.f32.mrb[105].mxu1  ;;  %v3144_v4 = vadd.f32 %v3143_v39, %v3142_v49  ;;  %v2622_v1 = vmax.f32 %v3954_v34, 0.0 }
 0x1bc   :  { %v2870_v52 = vadd.f32 %v2869_v25, %v2868_v32  ;;  %v1796_v44 = vpop.f32.mrb[111].mxu0  ;;  %v2620_v38 = vmax.f32 %v2305_v24, 0.0  ;;  %v3955_v63 = vpop.f32.mrb[106].mxu1  ;;  %v2495_v60 = vmax.f32 %v3827_v47, 0.0  ;;  %v2875_v22 = vsel %vm2640_vm3, %v2494_v53, 0.0 }
 0x1bd   :  { %v2871_v14 = vsel %vm2640_vm3, %v2492_v42, 0.0  ;;  %v2493_v45 = vmax.f32 %v1796_v44, 0.0  ;;  %v2308_v2 = vpop.f32.mrb[107].mxu1  ;;  %v3146_v27 = vadd.f32 %v3145_v55, %v3144_v4  ;;  %v2623_v6 = vmax.f32 %v3955_v63, 0.0 }
 0x1be   :  { %v2872_v61 = vadd.f32 %v2871_v14, %v2870_v52  ;;  %v2621_v10 = vmax.f32 %v2308_v2, 0.0  ;;  %v3147_v13 = vsel %vm2640_vm3, %v2620_v38, 0.0  ;;  %v2877_v35 = vsel %vm2640_vm3, %v2495_v60, 0.0 }
 0x1bf   :  { %v2873_v5 = vsel %vm2640_vm3, %v2493_v45, 0.0  ;;  %v3148_v37 = vadd.f32 %v3147_v13, %v3146_v27  ;;  %v3151_v44 = vsel %vm2640_vm3, %v2622_v1, 0.0 }
 0x1c0   :  { %v2874_v12 = vadd.f32 %v2873_v5, %v2872_v61  ;;  %v3149_v19 = vsel %vm2640_vm3, %v2621_v10, 0.0  ;;  %v3153_v61 = vsel %vm2640_vm3, %v2623_v6, 0.0 }
 0x1c1   :  { %v3830_v17 = vpop.f32.mrb[112].mxu0  ;;  %v3150_v63 = vadd.f32 %v3149_v19, %v3148_v37 }
 0x1c2   :  { %v2876_v29 = vadd.f32 %v2875_v22, %v2874_v12  ;;  %v1809_v32 = vpop.f32.mrb[113].mxu0  ;;  %v3958_v25 = vpop.f32.mrb[108].mxu1  ;;  %v2498_v53 = vmax.f32 %v3830_v17, 0.0 }
 0x1c3   :  { %v2496_v42 = vmax.f32 %v1809_v32, 0.0  ;;  %v3831_v47 = vpop.f32.mrb[114].mxu0  ;;  %v2321_v24 = vpop.f32.mrb[109].mxu1  ;;  %v3152_v5 = vadd.f32 %v3151_v44, %v3150_v63  ;;  %v2626_v12 = vmax.f32 %v3958_v25, 0.0 }
 0x1c4   :  { %v2878_v52 = vadd.f32 %v2877_v35, %v2876_v29  ;;  %v1812_v34 = vpop.f32.mrb[115].mxu0  ;;  %v2624_v39 = vmax.f32 %v2321_v24, 0.0  ;;  %v3959_v38 = vpop.f32.mrb[110].mxu1  ;;  %v2499_v55 = vmax.f32 %v3831_v47, 0.0  ;;  %v2883_v13 = vsel %vm2640_vm3, %v2498_v53, 0.0 }
 0x1c5   :  { %v2879_v14 = vsel %vm2640_vm3, %v2496_v42, 0.0  ;;  %v2497_v45 = vmax.f32 %v1812_v34, 0.0  ;;  %v2324_v49 = vpop.f32.mrb[111].mxu1  ;;  %v3154_v17 = vadd.f32 %v3153_v61, %v3152_v5  ;;  %v2627_v32 = vmax.f32 %v3959_v38, 0.0 }
 0x1c6   :  { %v2880_v2 = vadd.f32 %v2879_v14, %v2878_v52  ;;  %v2625_v4 = vmax.f32 %v2324_v49, 0.0  ;;  %v3155_v1 = vsel %vm2640_vm3, %v2624_v39, 0.0  ;;  %v2885_v6 = vsel %vm2640_vm3, %v2499_v55, 0.0 }
 0x1c7   :  { %v2881_v60 = vsel %vm2640_vm3, %v2497_v45, 0.0  ;;  %v3156_v37 = vadd.f32 %v3155_v1, %v3154_v17  ;;  %v3159_v34 = vsel %vm2640_vm3, %v2626_v12, 0.0 }
 0x1c8   :  { %v2882_v10 = vadd.f32 %v2881_v60, %v2880_v2  ;;  %v3157_v19 = vsel %vm2640_vm3, %v2625_v4, 0.0  ;;  %v3161_v2 = vsel %vm2640_vm3, %v2627_v32, 0.0 }
 0x1c9   :  { %v3834_v22 = vpop.f32.mrb[116].mxu0  ;;  %v3158_v38 = vadd.f32 %v3157_v19, %v3156_v37 }
 0x1ca   :  { %v2884_v27 = vadd.f32 %v2883_v13, %v2882_v10  ;;  %v1825_v29 = vpop.f32.mrb[117].mxu0  ;;  %v3962_v35 = vpop.f32.mrb[112].mxu1  ;;  %v2502_v53 = vmax.f32 %v3834_v22, 0.0 }
 0x1cb   :  { %v2500_v42 = vmax.f32 %v1825_v29, 0.0  ;;  %v3835_v47 = vpop.f32.mrb[118].mxu0  ;;  %v2337_v24 = vpop.f32.mrb[113].mxu1  ;;  %v3160_v60 = vadd.f32 %v3159_v34, %v3158_v38  ;;  %v2630_v10 = vmax.f32 %v3962_v35, 0.0 }
 0x1cc   :  { %v2886_v52 = vadd.f32 %v2885_v6, %v2884_v27  ;;  %v1828_v25 = vpop.f32.mrb[119].mxu0  ;;  %v2628_v44 = vmax.f32 %v2337_v24, 0.0  ;;  %v3963_v39 = vpop.f32.mrb[114].mxu1  ;;  %v2503_v61 = vmax.f32 %v3835_v47, 0.0  ;;  %v2891_v1 = vsel %vm2640_vm3, %v2502_v53, 0.0 }
 0x1cd   :  { %v2887_v14 = vsel %vm2640_vm3, %v2500_v42, 0.0  ;;  %v2501_v45 = vmax.f32 %v1828_v25, 0.0  ;;  %v2340_v63 = vpop.f32.mrb[115].mxu1  ;;  %v3162_v22 = vadd.f32 %v3161_v2, %v3160_v60  ;;  %v2631_v29 = vmax.f32 %v3963_v39, 0.0 }
 0x1ce   :  { %v2888_v49 = vadd.f32 %v2887_v14, %v2886_v52  ;;  %v2629_v5 = vmax.f32 %v2340_v63, 0.0  ;;  %v3163_v12 = vsel %vm2640_vm3, %v2628_v44, 0.0  ;;  %v2893_v32 = vsel %vm2640_vm3, %v2503_v61, 0.0 }
 0x1cf   :  { %v2889_v55 = vsel %vm2640_vm3, %v2501_v45, 0.0  ;;  %v3164_v37 = vadd.f32 %v3163_v12, %v3162_v22  ;;  %v3167_v25 = vsel %vm2640_vm3, %v2630_v10, 0.0 }
 0x1d0   :  { %v2890_v4 = vadd.f32 %v2889_v55, %v2888_v49  ;;  %v3165_v19 = vsel %vm2640_vm3, %v2629_v5, 0.0  ;;  %v3169_v49 = vsel %vm2640_vm3, %v2631_v29, 0.0 }
 0x1d1   :  { %v3838_v13 = vpop.f32.mrb[120].mxu0  ;;  %v3166_v39 = vadd.f32 %v3165_v19, %v3164_v37 }
 0x1d2   :  { %v2892_v17 = vadd.f32 %v2891_v1, %v2890_v4  ;;  %v1841_v27 = vpop.f32.mrb[121].mxu0  ;;  %v3966_v6 = vpop.f32.mrb[116].mxu1  ;;  %v2506_v53 = vmax.f32 %v3838_v13, 0.0 }
 0x1d3   :  { %v2504_v42 = vmax.f32 %v1841_v27, 0.0  ;;  %v3839_v47 = vpop.f32.mrb[122].mxu0  ;;  %v2353_v24 = vpop.f32.mrb[117].mxu1  ;;  %v3168_v55 = vadd.f32 %v3167_v25, %v3166_v39  ;;  %v2634_v4 = vmax.f32 %v3966_v6, 0.0 }
 0x1d4   :  { %v2894_v52 = vadd.f32 %v2893_v32, %v2892_v17  ;;  %v1844_v35 = vpop.f32.mrb[123].mxu0  ;;  %v2632_v34 = vmax.f32 %v2353_v24, 0.0  ;;  %v3967_v44 = vpop.f32.mrb[118].mxu1  ;;  %v2507_v2 = vmax.f32 %v3839_v47, 0.0  ;;  %v2899_v12 = vsel %vm2640_vm3, %v2506_v53, 0.0 }
 0x1d5   :  { %v2895_v14 = vsel %vm2640_vm3, %v2504_v42, 0.0  ;;  %v2505_v45 = vmax.f32 %v1844_v35, 0.0  ;;  %v2356_v38 = vpop.f32.mrb[119].mxu1  ;;  %v3170_v13 = vadd.f32 %v3169_v49, %v3168_v55  ;;  %v2635_v27 = vmax.f32 %v3967_v44, 0.0 }
 0x1d6   :  { %v2896_v63 = vadd.f32 %v2895_v14, %v2894_v52  ;;  %v2633_v60 = vmax.f32 %v2356_v38, 0.0  ;;  %v3171_v10 = vsel %vm2640_vm3, %v2632_v34, 0.0  ;;  %v2901_v29 = vsel %vm2640_vm3, %v2507_v2, 0.0 }
 0x1d7   :  { %v2897_v61 = vsel %vm2640_vm3, %v2505_v45, 0.0  ;;  %v3172_v37 = vadd.f32 %v3171_v10, %v3170_v13  ;;  %v3175_v35 = vsel %vm2640_vm3, %v2634_v4, 0.0 }
 0x1d8   :  { %v2898_v5 = vadd.f32 %v2897_v61, %v2896_v63  ;;  %v3173_v19 = vsel %vm2640_vm3, %v2633_v60, 0.0  ;;  %v3177_v63 = vsel %vm2640_vm3, %v2635_v27, 0.0 }
 0x1d9   :  { %v3842_v1 = vpop.f32.mrb[124].mxu0  ;;  %v3174_v44 = vadd.f32 %v3173_v19, %v3172_v37 }
 0x1da   :  { %v2900_v22 = vadd.f32 %v2899_v12, %v2898_v5  ;;  %v1857_v17 = vpop.f32.mrb[125].mxu0  ;;  %v3970_v32 = vpop.f32.mrb[120].mxu1  ;;  %v2510_v53 = vmax.f32 %v3842_v1, 0.0 }
 0x1db   :  { %v2508_v42 = vmax.f32 %v1857_v17, 0.0  ;;  %v3843_v47 = vpop.f32.mrb[126].mxu0  ;;  %v2369_v24 = vpop.f32.mrb[121].mxu1  ;;  %v3176_v61 = vadd.f32 %v3175_v35, %v3174_v44  ;;  %v2638_v5 = vmax.f32 %v3970_v32, 0.0 }
 0x1dc   :  { %v2902_v52 = vadd.f32 %v2901_v29, %v2900_v22  ;;  %v1860_v6 = vpop.f32.mrb[127].mxu0  ;;  %v2636_v25 = vmax.f32 %v2369_v24, 0.0  ;;  %v3971_v34 = vpop.f32.mrb[122].mxu1  ;;  %v2511_v49 = vmax.f32 %v3843_v47, 0.0  ;;  %v2907_v10 = vsel %vm2640_vm3, %v2510_v53, 0.0 }
 0x1dd   :  { %v2903_v14 = vsel %vm2640_vm3, %v2508_v42, 0.0  ;;  %v2509_v45 = vmax.f32 %v1860_v6, 0.0  ;;  %v2372_v39 = vpop.f32.mrb[123].mxu1  ;;  %v3178_v1 = vadd.f32 %v3177_v63, %v3176_v61  ;;  %v2639_v17 = vmax.f32 %v3971_v34, 0.0 }
 0x1de   :  { %v2904_v38 = vadd.f32 %v2903_v14, %v2902_v52  ;;  %v2637_v55 = vmax.f32 %v2372_v39, 0.0  ;;  %v3179_v4 = vsel %vm2640_vm3, %v2636_v25, 0.0  ;;  %v2909_v27 = vsel %vm2640_vm3, %v2511_v49, 0.0 }
 0x1df   :  { %v2905_v2 = vsel %vm2640_vm3, %v2509_v45, 0.0  ;;  %v3180_v47 = vadd.f32 %v3179_v4, %v3178_v1  ;;  %v3183_v32 = vsel %vm2640_vm3, %v2638_v5, 0.0  ;;  %v3185_v53 = vsel %vm2640_vm3, %v2639_v17, 0.0 }
 0x1e0   :  { %v2906_v60 = vadd.f32 %v2905_v2, %v2904_v38  ;;  %v3181_v19 = vsel %vm2640_vm3, %v2637_v55, 0.0  ;;  %v2516_v63 = vmax.f32 %v4653_v15, 0.0  ;;  %v2519_v15 = vmax.f32 %v4655_v18, 0.0 }
 0x1e1   :  { %v3846_v12 = vpop.f32.mrb[128].mxu0  ;;  %v3182_v35 = vadd.f32 %v3181_v19, %v3180_v47 }
 0x1e2   :  { %v2908_v13 = vadd.f32 %v2907_v10, %v2906_v60  ;;  %v1873_v22 = vpop.f32.mrb[129].mxu0  ;;  %v2514_v52 = vmax.f32 %v3846_v12, 0.0  ;;  %v2517_v60 = vmax.f32 %v4661_v23, 0.0  ;;  %v2518_v12 = vmax.f32 %v4644_v9, 0.0 }
 0x1e3   :  { %v2512_v29 = vmax.f32 %v1873_v22, 0.0  ;;  %v3847_v42 = vpop.f32.mrb[130].mxu0  ;;  %v3184_v44 = vadd.f32 %v3183_v32, %v3182_v35  ;;  %v2924_v1 = vsel %vm2640_vm3, %v2516_v63, 0.0  ;;  %v2520_v23 = vmax.f32 %v4681_v40, 0.0 }
 0x1e4   :  { %v2910_v37 = vadd.f32 %v2909_v27, %v2908_v13  ;;  %v1876_v24 = vpop.f32.mrb[131].mxu0  ;;  %v2515_v34 = vmax.f32 %v3847_v42, 0.0  ;;  %v2920_v49 = vsel %vm2640_vm3, %v2514_v52, 0.0  ;;  %v2926_v17 = vsel %vm2640_vm3, %v2517_v60, 0.0 }
 0x1e5   :  { %v2513_v6 = vmax.f32 %v1876_v24, 0.0  ;;  %v2917_v14 = vsel %vm2640_vm3, %v2512_v29, 0.0  ;;  %v5005_v2 = vadd.f32 %v3185_v53, %v3184_v44  ;;  %v2928_v29 = vsel %vm2640_vm3, %v2518_v12, 0.0 }
 0x1e6   :  { %v2911_v25 = vrot.slane %v2910_v37, 4  ;;  %v2922_v5 = vsel %vm2640_vm3, %v2515_v34, 0.0  ;;  %v2521_v9 = vmax.f32 %v4689_v48, 0.0  ;;  %v2522_v52 = vmax.f32 %v4672_v33, 0.0 }
 0x1e7   :  { %v2918_v45 = vsel %vm2640_vm3, %v2513_v6, 0.0  ;;  %v2932_v18 = vsel %vm2640_vm3, %v2520_v23, 0.0  ;;  %v2524_v48 = vmax.f32 %v4709_v0, 0.0  ;;  %v2525_v33 = vmax.f32 %v4717_v8, 0.0 }
 0x1e8   :  { %v2912_v39 = vadd.f32 %v2911_v25, %v2910_v37  ;;  %v2919_v38 = vadd.f32 %v2918_v45, %v2917_v14  ;;  %v2930_v37 = vsel %vm2640_vm3, %v2519_v15, 0.0  ;;  %v2523_v25 = vmax.f32 %v4683_v43, 0.0 }
 0x1e9   :  { %v2934_v40 = vsel %vm2640_vm3, %v2521_v9, 0.0  ;;  %v2936_v14 = vsel %vm2640_vm3, %v2522_v52, 0.0  ;;  %v2527_v43 = vmax.f32 %v4711_v3, 0.0  ;;  %v2942_v63 = vsel %vm2640_vm3, %v2525_v33, 0.0 }
 0x1ea   :  { %v2913_v61 = vrot.slane %v2912_v39, 2  ;;  %v2921_v55 = vadd.f32 %v2920_v49, %v2919_v38  ;;  %v2938_v45 = vsel %vm2640_vm3, %v2523_v25, 0.0  ;;  %v2528_v0 = vmax.f32 %v4737_v28, 0.0 }
 0x1eb   :  { %v2946_v60 = vsel %vm2640_vm3, %v2527_v43, 0.0  ;;  %v2529_v8 = vmax.f32 %v4742_v36, 0.0  ;;  %v2531_v3 = vmax.f32 %v4739_v31, 0.0  ;;  %v2532_v28 = vmax.f32 %v4755_v54, 0.0 }
 0x1ec   :  { %v2914_v4 = vadd.f32 %v2913_v61, %v2912_v39  ;;  %v2923_v10 = vadd.f32 %v2922_v5, %v2921_v55  ;;  %v2526_v39 = vmax.f32 %v4700_v58, 0.0  ;;  %v2530_v58 = vmax.f32 %v4728_v21, 0.0 }
 0x1ed   :  { %v2950_v12 = vsel %vm2640_vm3, %v2529_v8, 0.0  ;;  %v2954_v15 = vsel %vm2640_vm3, %v2531_v3, 0.0  ;;  %v2533_v36 = vmax.f32 %v4760_v62, 0.0  ;;  %v2534_v21 = vmax.f32 %v4752_v50, 0.0 }
 0x1ee   :  { %v2915_v13 = vrot.slane %v2914_v4, 1  ;;  %v2925_v22 = vadd.f32 %v2924_v1, %v2923_v10  ;;  %v2944_v61 = vsel %vm2640_vm3, %v2526_v39, 0.0  ;;  %v2535_v31 = vmax.f32 %v4757_v57, 0.0 }
 0x1ef   :  { %v2536_v54 = vmax.f32 %v4768_v16, 0.0  ;;  %v2537_v62 = vmax.f32 %v4773_v26, 0.0  ;;  %v2538_v50 = vmax.f32 %v4765_v11, 0.0  ;;  %v2539_v57 = vmax.f32 %v4770_v20, 0.0 }
 0x1f0   :  { %v2916_v19 = vadd.f32 %v2915_v13, %v2914_v4  ;;  %v2927_v27 = vadd.f32 %v2926_v17, %v2925_v22  ;;  %v2948_v4 = vsel %vm2640_vm3, %v2528_v0, 0.0  ;;  %v2952_v13 = vsel %vm2640_vm3, %v2530_v58, 0.0 }
 0x1f1   :  { %v2966_v52 = vsel %vm2640_vm3, %v2537_v62, 0.0  ;;  %v2540_v16 = vmax.f32 %v4780_v46, 0.0  ;;  %v3049_v25 = vrot.slane %v4863_v7, 4  ;;  %v2541_v11 = vmax.f32 %v4785_v56, 0.0 }
 0x1f2   :  { %v3196_v42 = vpack.c.bf16 %v2916_v19, %v2916_v19  ;;  %v2929_v47 = vadd.f32 %v2928_v29, %v2927_v27  ;;  %v2956_v19 = vsel %vm2640_vm3, %v2532_v28, 0.0  ;;  %v2958_v29 = vsel %vm2640_vm3, %v2533_v36, 0.0 }
 0x1f3   :  { %v2542_v20 = vmax.f32 %v4777_v41, 0.0  ;;  %v2974_v39 = vsel %vm2640_vm3, %v2541_v11, 0.0 }
 0x1f4   :  { %v3223_v24 = vunpack.c.l.b16 %v3196_v42  ;;  %v2931_v32 = vadd.f32 %v2930_v37, %v2929_v47  ;;  %v2960_v42 = vsel %vm2640_vm3, %v2534_v21, 0.0  ;;  %v2962_v37 = vsel %vm2640_vm3, %v2535_v31, 0.0 }
 0x1f5   :  { %v2976_v56 = vsel %vm2640_vm3, %v2542_v20, 0.0 }
 0x1f6   :  { %v5020_v6 = vsel %vm3232_vm7, %v3223_v24, %v4951_v59  ;;  %v2933_v35 = vadd.f32 %v2932_v18, %v2931_v32  ;;  %v2940_v59 = vsel %vm2640_vm3, %v2524_v48, 0.0  ;;  %v2964_v24 = vsel %vm2640_vm3, %v2536_v54, 0.0 }
 0x1f8   :  { %v2935_v53 = vadd.f32 %v2934_v40, %v2933_v35  ;;  %v2968_v35 = vsel %vm2640_vm3, %v2538_v50, 0.0  ;;  %v3118_v40 = vrot.slane %v4935_v30, 4 }
 0x1fa   :  { %v2937_v34 = vadd.f32 %v2936_v14, %v2935_v53  ;;  %v2970_v53 = vsel %vm2640_vm3, %v2539_v57, 0.0  ;;  %v3187_v14 = vrot.slane %v5005_v2, 4  ;;  %v3119_v46 = vadd.f32 %v3118_v40, %v4935_v30 }
 0x1fc   :  { %v2939_v44 = vadd.f32 %v2938_v45, %v2937_v34  ;;  %v2972_v34 = vsel %vm2640_vm3, %v2540_v16, 0.0  ;;  %v3050_v45 = vadd.f32 %v3049_v25, %v4863_v7 }
 0x1fe   :  { %v2941_v38 = vadd.f32 %v2940_v59, %v2939_v44  ;;  %v2543_v44 = vmax.f32 %v4782_v51, 0.0  ;;  %v3188_v59 = vadd.f32 %v3187_v14, %v5005_v2  ;;  %v3051_v43 = vrot.slane %v3050_v45, 2 }
 0x200   :  { %v2943_v49 = vadd.f32 %v2942_v63, %v2941_v38  ;;  %v3120_v63 = vrot.slane %v3119_v46, 2  ;;  %v2978_v41 = vsel %vm2640_vm3, %v2543_v44, 0.0  ;;  %v3052_v7 = vadd.f32 %v3051_v43, %v3050_v45 }
 0x202   :  { %v2945_v55 = vadd.f32 %v2944_v61, %v2943_v49  ;;  %v3189_v61 = vrot.slane %v3188_v59, 2  ;;  %v3053_v51 = vrot.slane %v3052_v7, 1 }
 0x204   :  { %v2947_v5 = vadd.f32 %v2946_v60, %v2945_v55  ;;  %v3121_v55 = vadd.f32 %v3120_v63, %v3119_v46  ;;  %v3190_v60 = vadd.f32 %v3189_v61, %v3188_v59 }
 0x206   :  { %v2949_v10 = vadd.f32 %v2948_v4, %v2947_v5  ;;  %v3122_v5 = vrot.slane %v3121_v55, 1  ;;  %v3191_v4 = vrot.slane %v3190_v60, 1 }
 0x208   :  { %v2951_v1 = vadd.f32 %v2950_v12, %v2949_v10  ;;  %v3054_v10 = vadd.f32 %v3053_v51, %v3052_v7  ;;  %v3123_v3 = vadd.f32 %v3122_v5, %v3121_v55 }
 0x20a   :  { %v2953_v22 = vadd.f32 %v2952_v13, %v2951_v1  ;;  %v3192_v1 = vadd.f32 %v3191_v4, %v3190_v60  ;;  %v3198_v28 = vpack.c.bf16 %v3054_v10, %v3054_v10 }
 0x20c   :  { %v2955_v17 = vadd.f32 %v2954_v15, %v2953_v22  ;;  %v3199_v22 = vpack.c.bf16 %v3123_v3, %v3123_v3  ;;  %v3200_v36 = vpack.c.bf16 %v3192_v1, %v3192_v1  ;;  %v3225_v21 = vunpack.c.l.b16 %v3198_v28 }
 0x20e   :  { %v2957_v27 = vadd.f32 %v2956_v19, %v2955_v17  ;;  %v3226_v19 = vunpack.c.l.b16 %v3199_v22  ;;  %v3227_v31 = vunpack.c.l.b16 %v3200_v36 }
 0x210   :  { %v2959_v23 = vadd.f32 %v2958_v29, %v2957_v27 }
 0x212   :  { %v2961_v47 = vadd.f32 %v2960_v42, %v2959_v23 }
 0x214   :  { %v2963_v9 = vadd.f32 %v2962_v37, %v2961_v47  ;;  %v3572_v47 = vld [vmem:[%s5092_s3] ss:$0 sm:$0xff] }
 0x216   :  { %v2965_v32 = vadd.f32 %v2964_v24, %v2963_v9 }
 0x218   :  { %v2967_v18 = vadd.f32 %v2966_v52, %v2965_v32 }
 0x21a   :  { %v2969_v26 = vadd.f32 %v2968_v35, %v2967_v18 }
 0x21c   :  { %v2971_v48 = vadd.f32 %v2970_v53, %v2969_v26 }
 0x21e   :  { %v2973_v33 = vadd.f32 %v2972_v34, %v2971_v48 }
 0x220   :  { %v2975_v38 = vadd.f32 %v2974_v39, %v2973_v33 }
 0x222   :  { %v2977_v49 = vadd.f32 %v2976_v56, %v2975_v38 }
 0x224   :  { %v2979_v0 = vadd.f32 %v2978_v41, %v2977_v49 }
 0x226   :  { %v2980_v30 = vrot.slane %v2979_v0, 4 }
 0x228   :  { %v2981_v8 = vadd.f32 %v2980_v30, %v2979_v0 }
 0x22a   :  { %v2982_v58 = vrot.slane %v2981_v8, 2 }
 0x22c   :  { %v2983_v2 = vadd.f32 %v2982_v58, %v2981_v8 }
 0x22e   :  { %v2984_v12 = vrot.slane %v2983_v2, 1 }
 0x230   :  { %v2985_v13 = vadd.f32 %v2984_v12, %v2983_v2 }
 0x232   :  { %v3197_v15 = vpack.c.bf16 %v2985_v13, %v2985_v13 }
 0x234   :  { %v3224_v17 = vunpack.c.l.b16 %v3197_v15 }
 0x236   :  { %v3235_v27 = vsel %vm3234_vm8, %v3224_v17, %v5020_v6 }
 0x237   :  { %v3237_v29 = vsel %vm3236_vm9, %v3225_v21, %v3235_v27 }
 0x238   :  { %v3239_v23 = vsel %vm3238_vm10, %v3226_v19, %v3237_v29 }
 0x239   :  { %v3241_v42 = vsel %vm3240_vm11, %v3227_v31, %v3239_v23 }
 0x23a   :  { %v3242_v54 = vpack.c.b16 %v3241_v42, %v3241_v42 }
 0x23c   :  { %3977 = vmatmul.mubr.msk.bf16.vlgmr.msra.gmra.mrb[124].mxu1 %vm2640_vm3, %v3242_v54 }
 0x30f   :  { %v3292_v37 = vpop.f32.mrb[124].mxu1 }
 0x310   :  { %v3293_v62 = vadd.f32 %v3572_v47, %v3292_v37  ;;  %v3978_v9 = vpop.f32.mrb[125].mxu1 }
 0x311   :  { %v3295_v50 = vpop.f32.mrb[126].mxu1 }
 0x312   :  { %3298 = vst [vmem:[#allocation2] sm:$0xff] %v3293_v62  ;;  %v3979_v6 = vpop.f32.mrb[127].mxu1 }
 0x313   :  { %4134 = shalt.err (!%p4131_p4)
}
 0x314   :  { %s4135_s3 = scalar_lea.hbm %s5093_s4, 128 }
 0x315   :  { %p4136_p5 = scmp.ne.s32.totalorder %s5093_s4, %s4135_s3  ;;  %p4139_p6 = scmp.lt.u32.totalorder %s4135_s3, %s5093_s4 }
 0x317   :  { %p4141_p7 = pnand %p4139_p6, %p4136_p5 }
 0x319   :  { %4144 = shalt.err (!%p4141_p7)
}
 0x31a   :  { %3308 = dma.vmem_to_hbm [thread:$0]  %s3306_s12, 128, %s5093_s4, [#allocation3]  }
 0x31b   :  { %4145 = dma.done.wait [#allocation3], 128  }
 0x31c   :  { %4146 = vsyncadd [#allocation3], 4294967168 }
 0x31d   :  { %3312 = vsyncpa [#allocation3], 1 }

</bundles_post_ra>
